<compile_context>
chip_gen: v5e
topology: v5e:2x2
jax: 0.10.0
libtpu: 0.0.40
codegen_flags: <defaults>
</compile_context>

<pallas_src>
import math
import functools

import jax
import jax.numpy as jnp
from jax import lax
from jax.experimental import pallas as pl
from jax.experimental.pallas import tpu as pltpu

EPS = 1e-5  # nn.LayerNorm default


# ----------------------------- fused kernel --------------------------------

def _layernorm(z, g, b):
    mean = jnp.mean(z, axis=-1, keepdims=True)
    zc = z - mean
    var = jnp.mean(zc * zc, axis=-1, keepdims=True)
    return zc * lax.rsqrt(var + EPS) * g + b


def fused_transformer_kernel(
    # resident inputs (block index constant across the grid -> stay in VMEM)
    x_ref, pe_ref, pw_ref, pb_ref, cw_ref, cb_ref,
    # per-layer weights (streamed: one L-slice per grid step; matmul weights bf16)
    qkvw_ref, qkvb_ref, outw_ref, outb_ref,
    f1w_ref, f1b_ref, f2w_ref, f2b_ref,
    g1_ref, b1_ref, g2_ref, b2_ref,
    # output
    o_ref,
    # VMEM scratch (persists across grid iterations)
    h_ref,
    *, B, S, H, dh):
    d = H * dh
    l = pl.program_id(0)

    # ---- prologue (layer 0): input projection + positional encoding -------
    @pl.when(l == 0)
    def _():
        proj = (jnp.dot(x_ref[...], pw_ref[...],
                        preferred_element_type=jnp.float32) + pb_ref[...])
        pe = pe_ref[...]                                   # [S, d]
        h_ref[...] = proj + jnp.concatenate([pe] * B, axis=0)

    x = h_ref[...]                                         # [B*S, d] f32
    xb = x.astype(jnp.bfloat16)

    # ---- multi-head self attention (scale folded into qkv_w at init) ------
    qkv = (jnp.dot(xb, qkvw_ref[...],
                   preferred_element_type=jnp.float32) + qkvb_ref[...])  # [B*S, 3d]

    ctx_batches = []
    for bi in range(B):
        r0 = bi * S
        heads = []
        for hi in range(H):
            c0 = hi * dh
            qh = qkv[r0:r0 + S, c0:c0 + dh]                # [S, dh] (vreg slices)
            kh = qkv[r0:r0 + S, d + c0:d + c0 + dh]
            vh = qkv[r0:r0 + S, 2 * d + c0:2 * d + c0 + dh]
            s = lax.dot_general(qh, kh, (((1,), (1,)), ((), ())),
                                preferred_element_type=jnp.float32)  # [S, S]
            s = s - jnp.max(s, axis=-1, keepdims=True)
            p = jnp.exp(s)
            p = p * pl.reciprocal(jnp.sum(p, axis=-1, keepdims=True),
                                  approx=False)
            heads.append(jnp.dot(p, vh, preferred_element_type=jnp.float32))
        ctx_batches.append(jnp.concatenate(heads, axis=1))  # [S, d] lane-dense
    ctx = jnp.concatenate(ctx_batches, axis=0)              # [B*S, d]

    a = (jnp.dot(ctx.astype(jnp.bfloat16), outw_ref[...],
                 preferred_element_type=jnp.float32) + outb_ref[...])
    h1 = _layernorm(x + a, g1_ref[...], b1_ref[...])        # post-LN (f32)

    # ---- feed-forward (ReLU), bf16 weight streaming ------------------------
    ff = jnp.maximum(
        jnp.dot(h1.astype(jnp.bfloat16), f1w_ref[...],
                preferred_element_type=jnp.float32) + f1b_ref[...], 0.0)
    ff = (jnp.dot(ff.astype(jnp.bfloat16), f2w_ref[...],
                  preferred_element_type=jnp.float32) + f2b_ref[...])
    h2 = _layernorm(h1 + ff, g2_ref[...], b2_ref[...])
    h_ref[...] = h2

    # ---- epilogue (last layer): classifier on encoder_output[:, 0, :] -----
    @pl.when(l == pl.num_programs(0) - 1)
    def _():
        cls_in = h2[0:S, :]       # batch 0 == rows 0..S-1 of the b*S+s layout
        logits = (jnp.dot(cls_in, cw_ref[...],
                          preferred_element_type=jnp.float32) + cb_ref[...])
        o_ref[...] = jax.nn.sigmoid(logits).astype(o_ref.dtype)


# ----------------------------- wrapper --------------------------------------

def _padded_bytes(shape, dtype):
    """Approx VMEM footprint of one buffer with (sublane, 128) tile padding."""
    item = jnp.dtype(dtype).itemsize
    r, c = shape[-2], shape[-1]
    sub = 8 * (4 // item)                      # 8 rows f32, 16 rows bf16
    lead = 1
    for s in shape[:-2]:
        lead *= s
    return lead * (-(-r // sub) * sub) * (-(-c // 128) * 128) * item


@functools.partial(jax.jit, static_argnames=('num_heads',))
def transformer_forward(params, x, *, num_heads):
    # x: [S, B, input_size]  (PyTorch batch_first=False)
    S, B, Din = x.shape
    d = params['proj_w'].shape[1]
    H = num_heads
    dh = d // H
    L = params['qkv_w'].shape[0]
    C = params['cls_w'].shape[1]
    F = params['ff1_w'].shape[2]

    # One-time layout op at the model boundary: seq-first -> batch-major rows.
    xb = jnp.transpose(x, (1, 0, 2)).reshape(B * S, Din)   # row b*S+s = x[s,b]
    pe = params['pe'][:S, 0, :]                            # [S, d] resident

    kernel = functools.partial(fused_transformer_kernel, B=B, S=S, H=H, dh=dh)

    def resident(shape):        # same block every grid step -> stays in VMEM
        return pl.BlockSpec(shape, lambda l: (0,) * len(shape))

    def layer(shape):           # stacked [L, ...]; stream slice l per grid step
        return pl.BlockSpec((None,) + shape, lambda l: (l,) + (0,) * len(shape))

    # Explicit VMEM budget: residents + per-layer slab (double-buffered) +
    # activation carry + output, with margin.
    resident_b = (_padded_bytes((B * S, Din), jnp.float32)
                  + _padded_bytes((S, d), jnp.float32)
                  + _padded_bytes((Din, d), jnp.float32)
                  + _padded_bytes((1, d), jnp.float32)
                  + _padded_bytes((d, C), jnp.float32)
                  + _padded_bytes((1, C), jnp.float32))
    layer_b = (_padded_bytes((d, 3 * d), jnp.bfloat16)
               + _padded_bytes((1, 3 * d), jnp.float32)
               + _padded_bytes((d, d), jnp.bfloat16)
               + _padded_bytes((1, d), jnp.float32)
               + _padded_bytes((d, F), jnp.bfloat16)
               + _padded_bytes((1, F), jnp.float32)
               + _padded_bytes((F, d), jnp.bfloat16)
               + _padded_bytes((1, d), jnp.float32)
               + 4 * _padded_bytes((1, d), jnp.float32))
    scratch_b = _padded_bytes((B * S, d), jnp.float32)
    out_b = _padded_bytes((S, C), jnp.float32)
    vmem_limit = min(int(2 * (resident_b + layer_b + out_b) + scratch_b)
                     + (8 << 20), 128 << 20)

    out = pl.pallas_call(
        kernel,
        out_shape=jax.ShapeDtypeStruct((S, C), jnp.float32),
        grid=(L,),
        in_specs=[
            resident((B * S, Din)), resident((S, d)),
            resident((Din, d)), resident((1, d)),
            resident((d, C)), resident((1, C)),
            layer((d, 3 * d)), layer((1, 3 * d)),
            layer((d, d)), layer((1, d)),
            layer((d, F)), layer((1, F)),
            layer((F, d)), layer((1, d)),
            layer((1, d)), layer((1, d)), layer((1, d)), layer((1, d)),
        ],
        out_specs=resident((S, C)),
        scratch_shapes=[pltpu.VMEM((B * S, d), jnp.float32)],  # activation carry
        compiler_params=pltpu.CompilerParams(
            dimension_semantics=("arbitrary",),   # layers are sequential
            vmem_limit_bytes=vmem_limit),
    )(xb, pe,
      params['proj_w'], params['proj_b'],
      params['cls_w'], params['cls_b'],
      params['qkv_w'], params['qkv_b'],
      params['out_w'], params['out_b'],
      params['ff1_w'], params['ff1_b'],
      params['ff2_w'], params['ff2_b'],
      params['ln1_g'], params['ln1_b'],
      params['ln2_g'], params['ln2_b'])
    return out


# ----------------------------- parameter init -------------------------------

def make_pe(max_len, d_model):
    pos = jnp.arange(max_len, dtype=jnp.float32)[:, None]
    div = jnp.exp(jnp.arange(0, d_model, 2, dtype=jnp.float32)
                  * (-math.log(10000.0) / d_model))
    pe = jnp.zeros((max_len, 1, d_model), jnp.float32)
    pe = pe.at[:, 0, 0::2].set(jnp.sin(pos * div))
    pe = pe.at[:, 0, 1::2].set(jnp.cos(pos * div))
    return pe


def init_params(key, input_size, num_heads, num_layers, hidden_dim, num_classes,
                ffn_dim=2048, max_len=1000):
    # TODO(synk): dropout layers are omitted (eval-mode identity).
    assert hidden_dim % num_heads == 0
    dh = hidden_dim // num_heads
    scale = 1.0 / math.sqrt(dh)
    keys = jax.random.split(key, 2 + num_layers)

    def lin(k, fan_in, fan_out):
        k1, k2 = jax.random.split(k)
        bound = 1.0 / math.sqrt(fan_in)
        w = jax.random.uniform(k1, (fan_in, fan_out), jnp.float32, -bound, bound)
        b = jax.random.uniform(k2, (1, fan_out), jnp.float32, -bound, bound)
        return w, b

    proj_w, proj_b = lin(keys[0], input_size, hidden_dim)
    cls_w, cls_b = lin(keys[1], hidden_dim, num_classes)

    per_layer = []
    for i in range(num_layers):
        lk = jax.random.split(keys[2 + i], 4)
        qkv_w, qkv_b = lin(lk[0], hidden_dim, 3 * hidden_dim)   # in_proj (q|k|v)
        # Fold the 1/sqrt(dh) attention scale into the Q projection (free).
        qkv_w = qkv_w.at[:, :hidden_dim].multiply(scale)
        qkv_b = qkv_b.at[:, :hidden_dim].multiply(scale)
        out_w, out_b = lin(lk[1], hidden_dim, hidden_dim)       # attn out_proj
        ff1_w, ff1_b = lin(lk[2], hidden_dim, ffn_dim)          # linear1
        ff2_w, ff2_b = lin(lk[3], ffn_dim, hidden_dim)          # linear2
        per_layer.append((
            qkv_w.astype(jnp.bfloat16), qkv_b,
            out_w.astype(jnp.bfloat16), out_b,
            ff1_w.astype(jnp.bfloat16), ff1_b,
            ff2_w.astype(jnp.bfloat16), ff2_b,
            jnp.ones((1, hidden_dim), jnp.float32),
            jnp.zeros((1, hidden_dim), jnp.float32),
            jnp.ones((1, hidden_dim), jnp.float32),
            jnp.zeros((1, hidden_dim), jnp.float32)))

    names = ['qkv_w', 'qkv_b', 'out_w', 'out_b', 'ff1_w', 'ff1_b', 'ff2_w',
             'ff2_b', 'ln1_g', 'ln1_b', 'ln2_g', 'ln2_b']
    stacked = {n: jnp.stack([p[i] for p in per_layer], axis=0)
               for i, n in enumerate(names)}

    return dict(proj_w=proj_w, proj_b=proj_b, cls_w=cls_w, cls_b=cls_b,
                pe=make_pe(max_len, hidden_dim), **stacked)


# ----------------------------- main -----------------------------------------

if __name__ == "__main__":
    SEQ, BATCH, INPUT_SIZE = 8, 2, 16
    NUM_HEADS, NUM_LAYERS, HIDDEN_DIM, NUM_CLASSES = 4, 2, 32, 4

    key = jax.random.PRNGKey(0)
    pkey, xkey = jax.random.split(key)

    params = init_params(pkey, INPUT_SIZE, NUM_HEADS, NUM_LAYERS,
                         HIDDEN_DIM, NUM_CLASSES)
    x = jax.random.normal(xkey, (SEQ, BATCH, INPUT_SIZE), jnp.float32)

    out = transformer_forward(params, x, num_heads=NUM_HEADS)
    jax.block_until_ready(out)

    # Mirrors the PyTorch module: classifier reads encoder_output[:, 0, :]
    # (batch index 0) -> output shape [seq_len, num_classes].
    assert out.shape == (SEQ, NUM_CLASSES), out.shape
    assert bool(jnp.all(jnp.isfinite(out)))
    assert bool(jnp.all((out >= 0.0) & (out <= 1.0)))
    print("KERNEL_OK")
</pallas_src>

<mosaic_0001>
module attributes {stable_mosaic.version = 11 : i64} {
  func.func @fused_transformer_kernel(%arg0: i32, %arg1: memref<16x16xf32, #tpu.memory_space<vmem>>, %arg2: memref<8x32xf32, #tpu.memory_space<vmem>>, %arg3: memref<16x32xf32, #tpu.memory_space<vmem>>, %arg4: memref<1x32xf32, #tpu.memory_space<vmem>>, %arg5: memref<32x4xf32, #tpu.memory_space<vmem>>, %arg6: memref<1x4xf32, #tpu.memory_space<vmem>>, %arg7: memref<1x32x96xbf16, #tpu.memory_space<vmem>>, %arg8: memref<1x1x96xf32, #tpu.memory_space<vmem>>, %arg9: memref<1x32x32xbf16, #tpu.memory_space<vmem>>, %arg10: memref<1x1x32xf32, #tpu.memory_space<vmem>>, %arg11: memref<1x32x2048xbf16, #tpu.memory_space<vmem>>, %arg12: memref<1x1x2048xf32, #tpu.memory_space<vmem>>, %arg13: memref<1x2048x32xbf16, #tpu.memory_space<vmem>>, %arg14: memref<1x1x32xf32, #tpu.memory_space<vmem>>, %arg15: memref<1x1x32xf32, #tpu.memory_space<vmem>>, %arg16: memref<1x1x32xf32, #tpu.memory_space<vmem>>, %arg17: memref<1x1x32xf32, #tpu.memory_space<vmem>>, %arg18: memref<1x1x32xf32, #tpu.memory_space<vmem>>, %arg19: memref<8x4xf32, #tpu.memory_space<vmem>>, %arg20: memref<16x32xf32, #tpu.memory_space<vmem>>) attributes {dimension_semantics = [#tpu.dimension_semantics<arbitrary>], iteration_bounds = array<i64: 2>, scalar_prefetch = 0 : i64, scratch_operands = 1 : i64, tpu.core_type = #tpu.core_type<tc>, window_params = [{pipeline_mode = #tpu.pipeline_mode<synchronous>, transform_indices = @transform_0, window_bounds = array<i64: 16, 16>}, {pipeline_mode = #tpu.pipeline_mode<synchronous>, transform_indices = @transform_1, window_bounds = array<i64: 8, 32>}, {pipeline_mode = #tpu.pipeline_mode<synchronous>, transform_indices = @transform_2, window_bounds = array<i64: 16, 32>}, {pipeline_mode = #tpu.pipeline_mode<synchronous>, transform_indices = @transform_3, window_bounds = array<i64: 1, 32>}, {pipeline_mode = #tpu.pipeline_mode<synchronous>, transform_indices = @transform_4, window_bounds = array<i64: 32, 4>}, {pipeline_mode = #tpu.pipeline_mode<synchronous>, transform_indices = @transform_5, window_bounds = array<i64: 1, 4>}, {transform_indices = @transform_6, window_bounds = array<i64: 1, 32, 96>}, {transform_indices = @transform_7, window_bounds = array<i64: 1, 1, 96>}, {transform_indices = @transform_8, window_bounds = array<i64: 1, 32, 32>}, {transform_indices = @transform_9, window_bounds = array<i64: 1, 1, 32>}, {transform_indices = @transform_10, window_bounds = array<i64: 1, 32, 2048>}, {transform_indices = @transform_11, window_bounds = array<i64: 1, 1, 2048>}, {transform_indices = @transform_12, window_bounds = array<i64: 1, 2048, 32>}, {transform_indices = @transform_13, window_bounds = array<i64: 1, 1, 32>}, {transform_indices = @transform_14, window_bounds = array<i64: 1, 1, 32>}, {transform_indices = @transform_15, window_bounds = array<i64: 1, 1, 32>}, {transform_indices = @transform_16, window_bounds = array<i64: 1, 1, 32>}, {transform_indices = @transform_17, window_bounds = array<i64: 1, 1, 32>}, {pipeline_mode = #tpu.pipeline_mode<synchronous>, transform_indices = @transform_18, window_bounds = array<i64: 8, 4>}]} {
    %c0_i32 = arith.constant 0 : i32
    %0 = arith.cmpi eq, %arg0, %c0_i32 : i32
    %1 = arith.extui %0 : i1 to i32
    %c0_i32_0 = arith.constant 0 : i32
    %2 = arith.cmpi ne, %1, %c0_i32_0 : i32
    scf.if %2 {
      %c0_87 = arith.constant 0 : index
      %c0_88 = arith.constant 0 : index
      %215 = vector.load %arg1[%c0_87, %c0_88] : memref<16x16xf32, #tpu.memory_space<vmem>>, vector<16x16xf32>
      %c0_89 = arith.constant 0 : index
      %c0_90 = arith.constant 0 : index
      %216 = vector.load %arg3[%c0_89, %c0_90] : memref<16x32xf32, #tpu.memory_space<vmem>>, vector<16x32xf32>
      %cst_91 = arith.constant dense<0.000000e+00> : vector<16x32xf32>
      %217 = tpu.matmul %215, %216, %cst_91 {dimension_numbers = #tpu.dot_dimension_numbers<[1], [0], [0], [1], [0, 0, 1, 1], [], []>} : vector<16x16xf32>, vector<16x32xf32>, vector<16x32xf32> -> vector<16x32xf32>
      %c0_92 = arith.constant 0 : index
      %c0_93 = arith.constant 0 : index
      %218 = vector.load %arg4[%c0_92, %c0_93] : memref<1x32xf32, #tpu.memory_space<vmem>>, vector<1x32xf32>
      %219 = vector.broadcast %218 : vector<1x32xf32> to vector<16x32xf32>
      %220 = arith.addf %217, %219 : vector<16x32xf32>
      %c0_94 = arith.constant 0 : index
      %c0_95 = arith.constant 0 : index
      %221 = vector.load %arg2[%c0_94, %c0_95] : memref<8x32xf32, #tpu.memory_space<vmem>>, vector<8x32xf32>
      %222 = tpu.concatenate %221, %221 in 0 : vector<8x32xf32>, vector<8x32xf32> -> vector<16x32xf32>
      %223 = arith.addf %220, %222 : vector<16x32xf32>
      %c0_96 = arith.constant 0 : index
      %c0_97 = arith.constant 0 : index
      %224 = vector.load %arg20[%c0_96, %c0_97] : memref<16x32xf32, #tpu.memory_space<vmem>>, vector<16x32xf32>
      tpu.vector_store %arg20[%c0_96, %c0_97], %223 {strides = array<i32>} : memref<16x32xf32, #tpu.memory_space<vmem>>, vector<16x32xf32>,
    } else {
    }
    %c0 = arith.constant 0 : index
    %c0_1 = arith.constant 0 : index
    %3 = vector.load %arg20[%c0, %c0_1] : memref<16x32xf32, #tpu.memory_space<vmem>>, vector<16x32xf32>
    %4 = arith.truncf %3 : vector<16x32xf32> to vector<16x32xbf16>
    %c0_2 = arith.constant 0 : index
    %c0_3 = arith.constant 0 : index
    %c0_4 = arith.constant 0 : index
    %5 = vector.load %arg7[%c0_2, %c0_3, %c0_4] : memref<1x32x96xbf16, #tpu.memory_space<vmem>>, vector<1x32x96xbf16>
    %6 = vector.shape_cast %5 : vector<1x32x96xbf16> to vector<32x96xbf16>
    %cst = arith.constant dense<0.000000e+00> : vector<16x96xf32>
    %7 = tpu.matmul %4, %6, %cst {dimension_numbers = #tpu.dot_dimension_numbers<[1], [0], [0], [1], [0, 0, 1, 1], [], []>} : vector<16x32xbf16>, vector<32x96xbf16>, vector<16x96xf32> -> vector<16x96xf32>
    %c0_5 = arith.constant 0 : index
    %c0_6 = arith.constant 0 : index
    %c0_7 = arith.constant 0 : index
    %8 = vector.load %arg8[%c0_5, %c0_6, %c0_7] : memref<1x1x96xf32, #tpu.memory_space<vmem>>, vector<1x1x96xf32>
    %9 = vector.shape_cast %8 : vector<1x1x96xf32> to vector<1x96xf32>
    %10 = vector.broadcast %9 : vector<1x96xf32> to vector<16x96xf32>
    %11 = arith.addf %7, %10 : vector<16x96xf32>
    %12 = vector.extract_strided_slice %11 {offsets = [0, 0], sizes = [8, 8], strides = [1, 1]} : vector<16x96xf32> to vector<8x8xf32>
    %13 = vector.extract_strided_slice %11 {offsets = [0, 32], sizes = [8, 8], strides = [1, 1]} : vector<16x96xf32> to vector<8x8xf32>
    %14 = vector.extract_strided_slice %11 {offsets = [0, 64], sizes = [8, 8], strides = [1, 1]} : vector<16x96xf32> to vector<8x8xf32>
    %cst_8 = arith.constant dense<0.000000e+00> : vector<8x8xf32>
    %15 = tpu.matmul %12, %13, %cst_8 {dimension_numbers = #tpu.dot_dimension_numbers<[1], [1], [0], [0], [0, 0, 1, 0], [], []>} : vector<8x8xf32>, vector<8x8xf32>, vector<8x8xf32> -> vector<8x8xf32>
    %cst_9 = arith.constant dense<0xFF800000> : vector<8xf32>
    %16 = vector.multi_reduction <maximumf>, %15, %cst_9 [1] : vector<8x8xf32> to vector<8xf32>
    %17 = vector.shape_cast %16 : vector<8xf32> to vector<8x1xf32>
    %18 = vector.broadcast %17 : vector<8x1xf32> to vector<8x8xf32>
    %19 = arith.subf %15, %18 : vector<8x8xf32>
    %20 = math.exp %19 : vector<8x8xf32>
    %cst_10 = arith.constant dense<0.000000e+00> : vector<8xf32>
    %21 = vector.multi_reduction <add>, %20, %cst_10 [1] : vector<8x8xf32> to vector<8xf32>
    %22 = vector.shape_cast %21 : vector<8xf32> to vector<8x1xf32>
    %23 = tpu.reciprocal %22 : vector<8x1xf32> -> vector<8x1xf32>
    %24 = vector.broadcast %23 : vector<8x1xf32> to vector<8x8xf32>
    %25 = arith.mulf %20, %24 : vector<8x8xf32>
    %cst_11 = arith.constant dense<0.000000e+00> : vector<8x8xf32>
    %26 = tpu.matmul %25, %14, %cst_11 {dimension_numbers = #tpu.dot_dimension_numbers<[1], [0], [0], [1], [0, 0, 1, 1], [], []>} : vector<8x8xf32>, vector<8x8xf32>, vector<8x8xf32> -> vector<8x8xf32>
    %27 = vector.extract_strided_slice %11 {offsets = [0, 8], sizes = [8, 8], strides = [1, 1]} : vector<16x96xf32> to vector<8x8xf32>
    %28 = vector.extract_strided_slice %11 {offsets = [0, 40], sizes = [8, 8], strides = [1, 1]} : vector<16x96xf32> to vector<8x8xf32>
    %29 = vector.extract_strided_slice %11 {offsets = [0, 72], sizes = [8, 8], strides = [1, 1]} : vector<16x96xf32> to vector<8x8xf32>
    %cst_12 = arith.constant dense<0.000000e+00> : vector<8x8xf32>
    %30 = tpu.matmul %27, %28, %cst_12 {dimension_numbers = #tpu.dot_dimension_numbers<[1], [1], [0], [0], [0, 0, 1, 0], [], []>} : vector<8x8xf32>, vector<8x8xf32>, vector<8x8xf32> -> vector<8x8xf32>
    %cst_13 = arith.constant dense<0xFF800000> : vector<8xf32>
    %31 = vector.multi_reduction <maximumf>, %30, %cst_13 [1] : vector<8x8xf32> to vector<8xf32>
    %32 = vector.shape_cast %31 : vector<8xf32> to vector<8x1xf32>
    %33 = vector.broadcast %32 : vector<8x1xf32> to vector<8x8xf32>
    %34 = arith.subf %30, %33 : vector<8x8xf32>
    %35 = math.exp %34 : vector<8x8xf32>
    %cst_14 = arith.constant dense<0.000000e+00> : vector<8xf32>
    %36 = vector.multi_reduction <add>, %35, %cst_14 [1] : vector<8x8xf32> to vector<8xf32>
    %37 = vector.shape_cast %36 : vector<8xf32> to vector<8x1xf32>
    %38 = tpu.reciprocal %37 : vector<8x1xf32> -> vector<8x1xf32>
    %39 = vector.broadcast %38 : vector<8x1xf32> to vector<8x8xf32>
    %40 = arith.mulf %35, %39 : vector<8x8xf32>
    %cst_15 = arith.constant dense<0.000000e+00> : vector<8x8xf32>
    %41 = tpu.matmul %40, %29, %cst_15 {dimension_numbers = #tpu.dot_dimension_numbers<[1], [0], [0], [1], [0, 0, 1, 1], [], []>} : vector<8x8xf32>, vector<8x8xf32>, vector<8x8xf32> -> vector<8x8xf32>
    %42 = vector.extract_strided_slice %11 {offsets = [0, 16], sizes = [8, 8], strides = [1, 1]} : vector<16x96xf32> to vector<8x8xf32>
    %43 = vector.extract_strided_slice %11 {offsets = [0, 48], sizes = [8, 8], strides = [1, 1]} : vector<16x96xf32> to vector<8x8xf32>
    %44 = vector.extract_strided_slice %11 {offsets = [0, 80], sizes = [8, 8], strides = [1, 1]} : vector<16x96xf32> to vector<8x8xf32>
    %cst_16 = arith.constant dense<0.000000e+00> : vector<8x8xf32>
    %45 = tpu.matmul %42, %43, %cst_16 {dimension_numbers = #tpu.dot_dimension_numbers<[1], [1], [0], [0], [0, 0, 1, 0], [], []>} : vector<8x8xf32>, vector<8x8xf32>, vector<8x8xf32> -> vector<8x8xf32>
    %cst_17 = arith.constant dense<0xFF800000> : vector<8xf32>
    %46 = vector.multi_reduction <maximumf>, %45, %cst_17 [1] : vector<8x8xf32> to vector<8xf32>
    %47 = vector.shape_cast %46 : vector<8xf32> to vector<8x1xf32>
    %48 = vector.broadcast %47 : vector<8x1xf32> to vector<8x8xf32>
    %49 = arith.subf %45, %48 : vector<8x8xf32>
    %50 = math.exp %49 : vector<8x8xf32>
    %cst_18 = arith.constant dense<0.000000e+00> : vector<8xf32>
    %51 = vector.multi_reduction <add>, %50, %cst_18 [1] : vector<8x8xf32> to vector<8xf32>
    %52 = vector.shape_cast %51 : vector<8xf32> to vector<8x1xf32>
    %53 = tpu.reciprocal %52 : vector<8x1xf32> -> vector<8x1xf32>
    %54 = vector.broadcast %53 : vector<8x1xf32> to vector<8x8xf32>
    %55 = arith.mulf %50, %54 : vector<8x8xf32>
    %cst_19 = arith.constant dense<0.000000e+00> : vector<8x8xf32>
    %56 = tpu.matmul %55, %44, %cst_19 {dimension_numbers = #tpu.dot_dimension_numbers<[1], [0], [0], [1], [0, 0, 1, 1], [], []>} : vector<8x8xf32>, vector<8x8xf32>, vector<8x8xf32> -> vector<8x8xf32>
    %57 = vector.extract_strided_slice %11 {offsets = [0, 24], sizes = [8, 8], strides = [1, 1]} : vector<16x96xf32> to vector<8x8xf32>
    %58 = vector.extract_strided_slice %11 {offsets = [0, 56], sizes = [8, 8], strides = [1, 1]} : vector<16x96xf32> to vector<8x8xf32>
    %59 = vector.extract_strided_slice %11 {offsets = [0, 88], sizes = [8, 8], strides = [1, 1]} : vector<16x96xf32> to vector<8x8xf32>
    %cst_20 = arith.constant dense<0.000000e+00> : vector<8x8xf32>
    %60 = tpu.matmul %57, %58, %cst_20 {dimension_numbers = #tpu.dot_dimension_numbers<[1], [1], [0], [0], [0, 0, 1, 0], [], []>} : vector<8x8xf32>, vector<8x8xf32>, vector<8x8xf32> -> vector<8x8xf32>
    %cst_21 = arith.constant dense<0xFF800000> : vector<8xf32>
    %61 = vector.multi_reduction <maximumf>, %60, %cst_21 [1] : vector<8x8xf32> to vector<8xf32>
    %62 = vector.shape_cast %61 : vector<8xf32> to vector<8x1xf32>
    %63 = vector.broadcast %62 : vector<8x1xf32> to vector<8x8xf32>
    %64 = arith.subf %60, %63 : vector<8x8xf32>
    %65 = math.exp %64 : vector<8x8xf32>
    %cst_22 = arith.constant dense<0.000000e+00> : vector<8xf32>
    %66 = vector.multi_reduction <add>, %65, %cst_22 [1] : vector<8x8xf32> to vector<8xf32>
    %67 = vector.shape_cast %66 : vector<8xf32> to vector<8x1xf32>
    %68 = tpu.reciprocal %67 : vector<8x1xf32> -> vector<8x1xf32>
    %69 = vector.broadcast %68 : vector<8x1xf32> to vector<8x8xf32>
    %70 = arith.mulf %65, %69 : vector<8x8xf32>
    %cst_23 = arith.constant dense<0.000000e+00> : vector<8x8xf32>
    %71 = tpu.matmul %70, %59, %cst_23 {dimension_numbers = #tpu.dot_dimension_numbers<[1], [0], [0], [1], [0, 0, 1, 1], [], []>} : vector<8x8xf32>, vector<8x8xf32>, vector<8x8xf32> -> vector<8x8xf32>
    %72 = tpu.concatenate %26, %41, %56, %71 in 1 : vector<8x8xf32>, vector<8x8xf32>, vector<8x8xf32>, vector<8x8xf32> -> vector<8x32xf32>
    %73 = vector.extract_strided_slice %11 {offsets = [8, 0], sizes = [8, 8], strides = [1, 1]} : vector<16x96xf32> to vector<8x8xf32>
    %74 = vector.extract_strided_slice %11 {offsets = [8, 32], sizes = [8, 8], strides = [1, 1]} : vector<16x96xf32> to vector<8x8xf32>
    %75 = vector.extract_strided_slice %11 {offsets = [8, 64], sizes = [8, 8], strides = [1, 1]} : vector<16x96xf32> to vector<8x8xf32>
    %cst_24 = arith.constant dense<0.000000e+00> : vector<8x8xf32>
    %76 = tpu.matmul %73, %74, %cst_24 {dimension_numbers = #tpu.dot_dimension_numbers<[1], [1], [0], [0], [0, 0, 1, 0], [], []>} : vector<8x8xf32>, vector<8x8xf32>, vector<8x8xf32> -> vector<8x8xf32>
    %cst_25 = arith.constant dense<0xFF800000> : vector<8xf32>
    %77 = vector.multi_reduction <maximumf>, %76, %cst_25 [1] : vector<8x8xf32> to vector<8xf32>
    %78 = vector.shape_cast %77 : vector<8xf32> to vector<8x1xf32>
    %79 = vector.broadcast %78 : vector<8x1xf32> to vector<8x8xf32>
    %80 = arith.subf %76, %79 : vector<8x8xf32>
    %81 = math.exp %80 : vector<8x8xf32>
    %cst_26 = arith.constant dense<0.000000e+00> : vector<8xf32>
    %82 = vector.multi_reduction <add>, %81, %cst_26 [1] : vector<8x8xf32> to vector<8xf32>
    %83 = vector.shape_cast %82 : vector<8xf32> to vector<8x1xf32>
    %84 = tpu.reciprocal %83 : vector<8x1xf32> -> vector<8x1xf32>
    %85 = vector.broadcast %84 : vector<8x1xf32> to vector<8x8xf32>
    %86 = arith.mulf %81, %85 : vector<8x8xf32>
    %cst_27 = arith.constant dense<0.000000e+00> : vector<8x8xf32>
    %87 = tpu.matmul %86, %75, %cst_27 {dimension_numbers = #tpu.dot_dimension_numbers<[1], [0], [0], [1], [0, 0, 1, 1], [], []>} : vector<8x8xf32>, vector<8x8xf32>, vector<8x8xf32> -> vector<8x8xf32>
    %88 = vector.extract_strided_slice %11 {offsets = [8, 8], sizes = [8, 8], strides = [1, 1]} : vector<16x96xf32> to vector<8x8xf32>
    %89 = vector.extract_strided_slice %11 {offsets = [8, 40], sizes = [8, 8], strides = [1, 1]} : vector<16x96xf32> to vector<8x8xf32>
    %90 = vector.extract_strided_slice %11 {offsets = [8, 72], sizes = [8, 8], strides = [1, 1]} : vector<16x96xf32> to vector<8x8xf32>
    %cst_28 = arith.constant dense<0.000000e+00> : vector<8x8xf32>
    %91 = tpu.matmul %88, %89, %cst_28 {dimension_numbers = #tpu.dot_dimension_numbers<[1], [1], [0], [0], [0, 0, 1, 0], [], []>} : vector<8x8xf32>, vector<8x8xf32>, vector<8x8xf32> -> vector<8x8xf32>
    %cst_29 = arith.constant dense<0xFF800000> : vector<8xf32>
    %92 = vector.multi_reduction <maximumf>, %91, %cst_29 [1] : vector<8x8xf32> to vector<8xf32>
    %93 = vector.shape_cast %92 : vector<8xf32> to vector<8x1xf32>
    %94 = vector.broadcast %93 : vector<8x1xf32> to vector<8x8xf32>
    %95 = arith.subf %91, %94 : vector<8x8xf32>
    %96 = math.exp %95 : vector<8x8xf32>
    %cst_30 = arith.constant dense<0.000000e+00> : vector<8xf32>
    %97 = vector.multi_reduction <add>, %96, %cst_30 [1] : vector<8x8xf32> to vector<8xf32>
    %98 = vector.shape_cast %97 : vector<8xf32> to vector<8x1xf32>
    %99 = tpu.reciprocal %98 : vector<8x1xf32> -> vector<8x1xf32>
    %100 = vector.broadcast %99 : vector<8x1xf32> to vector<8x8xf32>
    %101 = arith.mulf %96, %100 : vector<8x8xf32>
    %cst_31 = arith.constant dense<0.000000e+00> : vector<8x8xf32>
    %102 = tpu.matmul %101, %90, %cst_31 {dimension_numbers = #tpu.dot_dimension_numbers<[1], [0], [0], [1], [0, 0, 1, 1], [], []>} : vector<8x8xf32>, vector<8x8xf32>, vector<8x8xf32> -> vector<8x8xf32>
    %103 = vector.extract_strided_slice %11 {offsets = [8, 16], sizes = [8, 8], strides = [1, 1]} : vector<16x96xf32> to vector<8x8xf32>
    %104 = vector.extract_strided_slice %11 {offsets = [8, 48], sizes = [8, 8], strides = [1, 1]} : vector<16x96xf32> to vector<8x8xf32>
    %105 = vector.extract_strided_slice %11 {offsets = [8, 80], sizes = [8, 8], strides = [1, 1]} : vector<16x96xf32> to vector<8x8xf32>
    %cst_32 = arith.constant dense<0.000000e+00> : vector<8x8xf32>
    %106 = tpu.matmul %103, %104, %cst_32 {dimension_numbers = #tpu.dot_dimension_numbers<[1], [1], [0], [0], [0, 0, 1, 0], [], []>} : vector<8x8xf32>, vector<8x8xf32>, vector<8x8xf32> -> vector<8x8xf32>
    %cst_33 = arith.constant dense<0xFF800000> : vector<8xf32>
    %107 = vector.multi_reduction <maximumf>, %106, %cst_33 [1] : vector<8x8xf32> to vector<8xf32>
    %108 = vector.shape_cast %107 : vector<8xf32> to vector<8x1xf32>
    %109 = vector.broadcast %108 : vector<8x1xf32> to vector<8x8xf32>
    %110 = arith.subf %106, %109 : vector<8x8xf32>
    %111 = math.exp %110 : vector<8x8xf32>
    %cst_34 = arith.constant dense<0.000000e+00> : vector<8xf32>
    %112 = vector.multi_reduction <add>, %111, %cst_34 [1] : vector<8x8xf32> to vector<8xf32>
    %113 = vector.shape_cast %112 : vector<8xf32> to vector<8x1xf32>
    %114 = tpu.reciprocal %113 : vector<8x1xf32> -> vector<8x1xf32>
    %115 = vector.broadcast %114 : vector<8x1xf32> to vector<8x8xf32>
    %116 = arith.mulf %111, %115 : vector<8x8xf32>
    %cst_35 = arith.constant dense<0.000000e+00> : vector<8x8xf32>
    %117 = tpu.matmul %116, %105, %cst_35 {dimension_numbers = #tpu.dot_dimension_numbers<[1], [0], [0], [1], [0, 0, 1, 1], [], []>} : vector<8x8xf32>, vector<8x8xf32>, vector<8x8xf32> -> vector<8x8xf32>
    %118 = vector.extract_strided_slice %11 {offsets = [8, 24], sizes = [8, 8], strides = [1, 1]} : vector<16x96xf32> to vector<8x8xf32>
    %119 = vector.extract_strided_slice %11 {offsets = [8, 56], sizes = [8, 8], strides = [1, 1]} : vector<16x96xf32> to vector<8x8xf32>
    %120 = vector.extract_strided_slice %11 {offsets = [8, 88], sizes = [8, 8], strides = [1, 1]} : vector<16x96xf32> to vector<8x8xf32>
    %cst_36 = arith.constant dense<0.000000e+00> : vector<8x8xf32>
    %121 = tpu.matmul %118, %119, %cst_36 {dimension_numbers = #tpu.dot_dimension_numbers<[1], [1], [0], [0], [0, 0, 1, 0], [], []>} : vector<8x8xf32>, vector<8x8xf32>, vector<8x8xf32> -> vector<8x8xf32>
    %cst_37 = arith.constant dense<0xFF800000> : vector<8xf32>
    %122 = vector.multi_reduction <maximumf>, %121, %cst_37 [1] : vector<8x8xf32> to vector<8xf32>
    %123 = vector.shape_cast %122 : vector<8xf32> to vector<8x1xf32>
    %124 = vector.broadcast %123 : vector<8x1xf32> to vector<8x8xf32>
    %125 = arith.subf %121, %124 : vector<8x8xf32>
    %126 = math.exp %125 : vector<8x8xf32>
    %cst_38 = arith.constant dense<0.000000e+00> : vector<8xf32>
    %127 = vector.multi_reduction <add>, %126, %cst_38 [1] : vector<8x8xf32> to vector<8xf32>
    %128 = vector.shape_cast %127 : vector<8xf32> to vector<8x1xf32>
    %129 = tpu.reciprocal %128 : vector<8x1xf32> -> vector<8x1xf32>
    %130 = vector.broadcast %129 : vector<8x1xf32> to vector<8x8xf32>
    %131 = arith.mulf %126, %130 : vector<8x8xf32>
    %cst_39 = arith.constant dense<0.000000e+00> : vector<8x8xf32>
    %132 = tpu.matmul %131, %120, %cst_39 {dimension_numbers = #tpu.dot_dimension_numbers<[1], [0], [0], [1], [0, 0, 1, 1], [], []>} : vector<8x8xf32>, vector<8x8xf32>, vector<8x8xf32> -> vector<8x8xf32>
    %133 = tpu.concatenate %87, %102, %117, %132 in 1 : vector<8x8xf32>, vector<8x8xf32>, vector<8x8xf32>, vector<8x8xf32> -> vector<8x32xf32>
    %134 = tpu.concatenate %72, %133 in 0 : vector<8x32xf32>, vector<8x32xf32> -> vector<16x32xf32>
    %135 = arith.truncf %134 : vector<16x32xf32> to vector<16x32xbf16>
    %c0_40 = arith.constant 0 : index
    %c0_41 = arith.constant 0 : index
    %c0_42 = arith.constant 0 : index
    %136 = vector.load %arg9[%c0_40, %c0_41, %c0_42] : memref<1x32x32xbf16, #tpu.memory_space<vmem>>, vector<1x32x32xbf16>
    %137 = vector.shape_cast %136 : vector<1x32x32xbf16> to vector<32x32xbf16>
    %cst_43 = arith.constant dense<0.000000e+00> : vector<16x32xf32>
    %138 = tpu.matmul %135, %137, %cst_43 {dimension_numbers = #tpu.dot_dimension_numbers<[1], [0], [0], [1], [0, 0, 1, 1], [], []>} : vector<16x32xbf16>, vector<32x32xbf16>, vector<16x32xf32> -> vector<16x32xf32>
    %c0_44 = arith.constant 0 : index
    %c0_45 = arith.constant 0 : index
    %c0_46 = arith.constant 0 : index
    %139 = vector.load %arg10[%c0_44, %c0_45, %c0_46] : memref<1x1x32xf32, #tpu.memory_space<vmem>>, vector<1x1x32xf32>
    %140 = vector.shape_cast %139 : vector<1x1x32xf32> to vector<1x32xf32>
    %141 = vector.broadcast %140 : vector<1x32xf32> to vector<16x32xf32>
    %142 = arith.addf %138, %141 : vector<16x32xf32>
    %143 = arith.addf %3, %142 : vector<16x32xf32>
    %c0_47 = arith.constant 0 : index
    %c0_48 = arith.constant 0 : index
    %c0_49 = arith.constant 0 : index
    %144 = vector.load %arg15[%c0_47, %c0_48, %c0_49] : memref<1x1x32xf32, #tpu.memory_space<vmem>>, vector<1x1x32xf32>
    %145 = vector.shape_cast %144 : vector<1x1x32xf32> to vector<1x32xf32>
    %c0_50 = arith.constant 0 : index
    %c0_51 = arith.constant 0 : index
    %c0_52 = arith.constant 0 : index
    %146 = vector.load %arg16[%c0_50, %c0_51, %c0_52] : memref<1x1x32xf32, #tpu.memory_space<vmem>>, vector<1x1x32xf32>
    %147 = vector.shape_cast %146 : vector<1x1x32xf32> to vector<1x32xf32>
    %cst_53 = arith.constant dense<0.000000e+00> : vector<16xf32>
    %148 = vector.multi_reduction <add>, %143, %cst_53 [1] : vector<16x32xf32> to vector<16xf32>
    %149 = vector.shape_cast %148 : vector<16xf32> to vector<16x1xf32>
    %cst_54 = arith.constant 3.200000e+01 : f32
    %150 = vector.broadcast %cst_54 : f32 to vector<16x1xf32>
    %151 = arith.divf %149, %150 : vector<16x1xf32>
    %152 = vector.broadcast %151 : vector<16x1xf32> to vector<16x32xf32>
    %153 = arith.subf %143, %152 : vector<16x32xf32>
    %154 = arith.mulf %153, %153 : vector<16x32xf32>
    %cst_55 = arith.constant dense<0.000000e+00> : vector<16xf32>
    %155 = vector.multi_reduction <add>, %154, %cst_55 [1] : vector<16x32xf32> to vector<16xf32>
    %156 = vector.shape_cast %155 : vector<16xf32> to vector<16x1xf32>
    %cst_56 = arith.constant 3.200000e+01 : f32
    %157 = vector.broadcast %cst_56 : f32 to vector<16x1xf32>
    %158 = arith.divf %156, %157 : vector<16x1xf32>
    %cst_57 = arith.constant 9.99999974E-6 : f32
    %159 = vector.broadcast %cst_57 : f32 to vector<16x1xf32>
    %160 = arith.addf %158, %159 : vector<16x1xf32>
    %161 = math.rsqrt %160 : vector<16x1xf32>
    %162 = vector.broadcast %161 : vector<16x1xf32> to vector<16x32xf32>
    %163 = arith.mulf %153, %162 : vector<16x32xf32>
    %164 = vector.broadcast %145 : vector<1x32xf32> to vector<16x32xf32>
    %165 = arith.mulf %163, %164 : vector<16x32xf32>
    %166 = vector.broadcast %147 : vector<1x32xf32> to vector<16x32xf32>
    %167 = arith.addf %165, %166 : vector<16x32xf32>
    %168 = arith.truncf %167 : vector<16x32xf32> to vector<16x32xbf16>
    %c0_58 = arith.constant 0 : index
    %c0_59 = arith.constant 0 : index
    %c0_60 = arith.constant 0 : index
    %169 = vector.load %arg11[%c0_58, %c0_59, %c0_60] : memref<1x32x2048xbf16, #tpu.memory_space<vmem>>, vector<1x32x2048xbf16>
    %170 = vector.shape_cast %169 : vector<1x32x2048xbf16> to vector<32x2048xbf16>
    %cst_61 = arith.constant dense<0.000000e+00> : vector<16x2048xf32>
    %171 = tpu.matmul %168, %170, %cst_61 {dimension_numbers = #tpu.dot_dimension_numbers<[1], [0], [0], [1], [0, 0, 1, 1], [], []>} : vector<16x32xbf16>, vector<32x2048xbf16>, vector<16x2048xf32> -> vector<16x2048xf32>
    %c0_62 = arith.constant 0 : index
    %c0_63 = arith.constant 0 : index
    %c0_64 = arith.constant 0 : index
    %172 = vector.load %arg12[%c0_62, %c0_63, %c0_64] : memref<1x1x2048xf32, #tpu.memory_space<vmem>>, vector<1x1x2048xf32>
    %173 = vector.shape_cast %172 : vector<1x1x2048xf32> to vector<1x2048xf32>
    %174 = vector.broadcast %173 : vector<1x2048xf32> to vector<16x2048xf32>
    %175 = arith.addf %171, %174 : vector<16x2048xf32>
    %cst_65 = arith.constant 0.000000e+00 : f32
    %176 = vector.broadcast %cst_65 : f32 to vector<16x2048xf32>
    %177 = arith.maximumf %175, %176 : vector<16x2048xf32>
    %178 = arith.truncf %177 : vector<16x2048xf32> to vector<16x2048xbf16>
    %c0_66 = arith.constant 0 : index
    %c0_67 = arith.constant 0 : index
    %c0_68 = arith.constant 0 : index
    %179 = vector.load %arg13[%c0_66, %c0_67, %c0_68] : memref<1x2048x32xbf16, #tpu.memory_space<vmem>>, vector<1x2048x32xbf16>
    %180 = vector.shape_cast %179 : vector<1x2048x32xbf16> to vector<2048x32xbf16>
    %cst_69 = arith.constant dense<0.000000e+00> : vector<16x32xf32>
    %181 = tpu.matmul %178, %180, %cst_69 {dimension_numbers = #tpu.dot_dimension_numbers<[1], [0], [0], [1], [0, 0, 1, 1], [], []>} : vector<16x2048xbf16>, vector<2048x32xbf16>, vector<16x32xf32> -> vector<16x32xf32>
    %c0_70 = arith.constant 0 : index
    %c0_71 = arith.constant 0 : index
    %c0_72 = arith.constant 0 : index
    %182 = vector.load %arg14[%c0_70, %c0_71, %c0_72] : memref<1x1x32xf32, #tpu.memory_space<vmem>>, vector<1x1x32xf32>
    %183 = vector.shape_cast %182 : vector<1x1x32xf32> to vector<1x32xf32>
    %184 = vector.broadcast %183 : vector<1x32xf32> to vector<16x32xf32>
    %185 = arith.addf %181, %184 : vector<16x32xf32>
    %186 = arith.addf %167, %185 : vector<16x32xf32>
    %c0_73 = arith.constant 0 : index
    %c0_74 = arith.constant 0 : index
    %c0_75 = arith.constant 0 : index
    %187 = vector.load %arg17[%c0_73, %c0_74, %c0_75] : memref<1x1x32xf32, #tpu.memory_space<vmem>>, vector<1x1x32xf32>
    %188 = vector.shape_cast %187 : vector<1x1x32xf32> to vector<1x32xf32>
    %c0_76 = arith.constant 0 : index
    %c0_77 = arith.constant 0 : index
    %c0_78 = arith.constant 0 : index
    %189 = vector.load %arg18[%c0_76, %c0_77, %c0_78] : memref<1x1x32xf32, #tpu.memory_space<vmem>>, vector<1x1x32xf32>
    %190 = vector.shape_cast %189 : vector<1x1x32xf32> to vector<1x32xf32>
    %cst_79 = arith.constant dense<0.000000e+00> : vector<16xf32>
    %191 = vector.multi_reduction <add>, %186, %cst_79 [1] : vector<16x32xf32> to vector<16xf32>
    %192 = vector.shape_cast %191 : vector<16xf32> to vector<16x1xf32>
    %cst_80 = arith.constant 3.200000e+01 : f32
    %193 = vector.broadcast %cst_80 : f32 to vector<16x1xf32>
    %194 = arith.divf %192, %193 : vector<16x1xf32>
    %195 = vector.broadcast %194 : vector<16x1xf32> to vector<16x32xf32>
    %196 = arith.subf %186, %195 : vector<16x32xf32>
    %197 = arith.mulf %196, %196 : vector<16x32xf32>
    %cst_81 = arith.constant dense<0.000000e+00> : vector<16xf32>
    %198 = vector.multi_reduction <add>, %197, %cst_81 [1] : vector<16x32xf32> to vector<16xf32>
    %199 = vector.shape_cast %198 : vector<16xf32> to vector<16x1xf32>
    %cst_82 = arith.constant 3.200000e+01 : f32
    %200 = vector.broadcast %cst_82 : f32 to vector<16x1xf32>
    %201 = arith.divf %199, %200 : vector<16x1xf32>
    %cst_83 = arith.constant 9.99999974E-6 : f32
    %202 = vector.broadcast %cst_83 : f32 to vector<16x1xf32>
    %203 = arith.addf %201, %202 : vector<16x1xf32>
    %204 = math.rsqrt %203 : vector<16x1xf32>
    %205 = vector.broadcast %204 : vector<16x1xf32> to vector<16x32xf32>
    %206 = arith.mulf %196, %205 : vector<16x32xf32>
    %207 = vector.broadcast %188 : vector<1x32xf32> to vector<16x32xf32>
    %208 = arith.mulf %206, %207 : vector<16x32xf32>
    %209 = vector.broadcast %190 : vector<1x32xf32> to vector<16x32xf32>
    %210 = arith.addf %208, %209 : vector<16x32xf32>
    %c0_84 = arith.constant 0 : index
    %c0_85 = arith.constant 0 : index
    %211 = vector.load %arg20[%c0_84, %c0_85] : memref<16x32xf32, #tpu.memory_space<vmem>>, vector<16x32xf32>
    tpu.vector_store %arg20[%c0_84, %c0_85], %210 {strides = array<i32>} : memref<16x32xf32, #tpu.memory_space<vmem>>, vector<16x32xf32>,
    %c1_i32 = arith.constant 1 : i32
    %212 = arith.cmpi eq, %arg0, %c1_i32 : i32
    %213 = arith.extui %212 : i1 to i32
    %c0_i32_86 = arith.constant 0 : i32
    %214 = arith.cmpi ne, %213, %c0_i32_86 : i32
    scf.if %214 {
      %215 = vector.extract_strided_slice %210 {offsets = [0, 0], sizes = [8, 32], strides = [1, 1]} : vector<16x32xf32> to vector<8x32xf32>
      %c0_87 = arith.constant 0 : index
      %c0_88 = arith.constant 0 : index
      %216 = vector.load %arg5[%c0_87, %c0_88] : memref<32x4xf32, #tpu.memory_space<vmem>>, vector<32x4xf32>
      %cst_89 = arith.constant dense<0.000000e+00> : vector<8x4xf32>
      %217 = tpu.matmul %215, %216, %cst_89 {dimension_numbers = #tpu.dot_dimension_numbers<[1], [0], [0], [1], [0, 0, 1, 1], [], []>} : vector<8x32xf32>, vector<32x4xf32>, vector<8x4xf32> -> vector<8x4xf32>
      %c0_90 = arith.constant 0 : index
      %c0_91 = arith.constant 0 : index
      %218 = vector.load %arg6[%c0_90, %c0_91] : memref<1x4xf32, #tpu.memory_space<vmem>>, vector<1x4xf32>
      %219 = vector.broadcast %218 : vector<1x4xf32> to vector<8x4xf32>
      %220 = arith.addf %217, %219 : vector<8x4xf32>
      %221 = arith.negf %220 : vector<8x4xf32>
      %222 = math.exp %221 : vector<8x4xf32>
      %cst_92 = arith.constant 1.000000e+00 : f32
      %223 = vector.broadcast %cst_92 : f32 to vector<8x4xf32>
      %224 = arith.addf %223, %222 : vector<8x4xf32>
      %225 = arith.divf %223, %224 : vector<8x4xf32>
      %c0_93 = arith.constant 0 : index
      %c0_94 = arith.constant 0 : index
      %226 = vector.load %arg19[%c0_93, %c0_94] : memref<8x4xf32, #tpu.memory_space<vmem>>, vector<8x4xf32>
      tpu.vector_store %arg19[%c0_93, %c0_94], %225 {strides = array<i32>} : memref<8x4xf32, #tpu.memory_space<vmem>>, vector<8x4xf32>,
    } else {
    }
    return
  }
  func.func @transform_0(%arg0: i32) -> (i32, i32) {
    %c0_i32 = arith.constant 0 : i32
    %c0_i32_0 = arith.constant 0 : i32
    %c0_i32_1 = arith.constant 0 : i32
    return %c0_i32, %c0_i32_0 : i32, i32
  }
  func.func @transform_1(%arg0: i32) -> (i32, i32) {
    %c0_i32 = arith.constant 0 : i32
    %c0_i32_0 = arith.constant 0 : i32
    %c0_i32_1 = arith.constant 0 : i32
    return %c0_i32, %c0_i32_0 : i32, i32
  }
  func.func @transform_2(%arg0: i32) -> (i32, i32) {
    %c0_i32 = arith.constant 0 : i32
    %c0_i32_0 = arith.constant 0 : i32
    %c0_i32_1 = arith.constant 0 : i32
    return %c0_i32, %c0_i32_0 : i32, i32
  }
  func.func @transform_3(%arg0: i32) -> (i32, i32) {
    %c0_i32 = arith.constant 0 : i32
    %c0_i32_0 = arith.constant 0 : i32
    %c0_i32_1 = arith.constant 0 : i32
    return %c0_i32, %c0_i32_0 : i32, i32
  }
  func.func @transform_4(%arg0: i32) -> (i32, i32) {
    %c0_i32 = arith.constant 0 : i32
    %c0_i32_0 = arith.constant 0 : i32
    %c0_i32_1 = arith.constant 0 : i32
    return %c0_i32, %c0_i32_0 : i32, i32
  }
  func.func @transform_5(%arg0: i32) -> (i32, i32) {
    %c0_i32 = arith.constant 0 : i32
    %c0_i32_0 = arith.constant 0 : i32
    %c0_i32_1 = arith.constant 0 : i32
    return %c0_i32, %c0_i32_0 : i32, i32
  }
  func.func @transform_6(%arg0: i32) -> (i32, i32, i32) {
    %c0_i32 = arith.constant 0 : i32
    %c0_i32_0 = arith.constant 0 : i32
    %c0_i32_1 = arith.constant 0 : i32
    return %arg0, %c0_i32, %c0_i32_0 : i32, i32, i32
  }
  func.func @transform_7(%arg0: i32) -> (i32, i32, i32) {
    %c0_i32 = arith.constant 0 : i32
    %c0_i32_0 = arith.constant 0 : i32
    %c0_i32_1 = arith.constant 0 : i32
    return %arg0, %c0_i32, %c0_i32_0 : i32, i32, i32
  }
  func.func @transform_8(%arg0: i32) -> (i32, i32, i32) {
    %c0_i32 = arith.constant 0 : i32
    %c0_i32_0 = arith.constant 0 : i32
    %c0_i32_1 = arith.constant 0 : i32
    return %arg0, %c0_i32, %c0_i32_0 : i32, i32, i32
  }
  func.func @transform_9(%arg0: i32) -> (i32, i32, i32) {
    %c0_i32 = arith.constant 0 : i32
    %c0_i32_0 = arith.constant 0 : i32
    %c0_i32_1 = arith.constant 0 : i32
    return %arg0, %c0_i32, %c0_i32_0 : i32, i32, i32
  }
  func.func @transform_10(%arg0: i32) -> (i32, i32, i32) {
    %c0_i32 = arith.constant 0 : i32
    %c0_i32_0 = arith.constant 0 : i32
    %c0_i32_1 = arith.constant 0 : i32
    return %arg0, %c0_i32, %c0_i32_0 : i32, i32, i32
  }
  func.func @transform_11(%arg0: i32) -> (i32, i32, i32) {
    %c0_i32 = arith.constant 0 : i32
    %c0_i32_0 = arith.constant 0 : i32
    %c0_i32_1 = arith.constant 0 : i32
    return %arg0, %c0_i32, %c0_i32_0 : i32, i32, i32
  }
  func.func @transform_12(%arg0: i32) -> (i32, i32, i32) {
    %c0_i32 = arith.constant 0 : i32
    %c0_i32_0 = arith.constant 0 : i32
    %c0_i32_1 = arith.constant 0 : i32
    return %arg0, %c0_i32, %c0_i32_0 : i32, i32, i32
  }
  func.func @transform_13(%arg0: i32) -> (i32, i32, i32) {
    %c0_i32 = arith.constant 0 : i32
    %c0_i32_0 = arith.constant 0 : i32
    %c0_i32_1 = arith.constant 0 : i32
    return %arg0, %c0_i32, %c0_i32_0 : i32, i32, i32
  }
  func.func @transform_14(%arg0: i32) -> (i32, i32, i32) {
    %c0_i32 = arith.constant 0 : i32
    %c0_i32_0 = arith.constant 0 : i32
    %c0_i32_1 = arith.constant 0 : i32
    return %arg0, %c0_i32, %c0_i32_0 : i32, i32, i32
  }
  func.func @transform_15(%arg0: i32) -> (i32, i32, i32) {
    %c0_i32 = arith.constant 0 : i32
    %c0_i32_0 = arith.constant 0 : i32
    %c0_i32_1 = arith.constant 0 : i32
    return %arg0, %c0_i32, %c0_i32_0 : i32, i32, i32
  }
  func.func @transform_16(%arg0: i32) -> (i32, i32, i32) {
    %c0_i32 = arith.constant 0 : i32
    %c0_i32_0 = arith.constant 0 : i32
    %c0_i32_1 = arith.constant 0 : i32
    return %arg0, %c0_i32, %c0_i32_0 : i32, i32, i32
  }
  func.func @transform_17(%arg0: i32) -> (i32, i32, i32) {
    %c0_i32 = arith.constant 0 : i32
    %c0_i32_0 = arith.constant 0 : i32
    %c0_i32_1 = arith.constant 0 : i32
    return %arg0, %c0_i32, %c0_i32_0 : i32, i32, i32
  }
  func.func @transform_18(%arg0: i32) -> (i32, i32) {
    %c0_i32 = arith.constant 0 : i32
    %c0_i32_0 = arith.constant 0 : i32
    %c0_i32_1 = arith.constant 0 : i32
    return %c0_i32, %c0_i32_0 : i32, i32
  }
}

</mosaic_0001>

<bundles_post_ra>
// kernel: transformer_forward.1
= control target key start
LH: loop header
LB: loop body
LE: loop exit
PB: predicated region body
PF: predicated region fallthrough
CT: control target
= control target key end

     0   :  { %s4695_s27 = smov 0   ;;  %s5287_s0 = inlined_call_operand.vmem [shape: f32[16,16], index: 0, kind: input, shape index: {}]   ;;  %s5288_s1 = inlined_call_operand.vmem [shape: f32[8,32], index: 1, kind: input, shape index: {}]   ;;  %s5289_s2 = inlined_call_operand.vmem [shape: f32[16,32], index: 2, kind: input, shape index: {}]   ;;  %s5290_s3 = inlined_call_operand.vmem [shape: f32[1,32], index: 3, kind: input, shape index: {}]   ;;  %s5291_s4 = inlined_call_operand.vmem [shape: f32[32,4], index: 4, kind: input, shape index: {}]   ;;  %s5292_s5 = inlined_call_operand.vmem [shape: f32[1,4], index: 5, kind: input, shape index: {}]   ;;  %s5293_s6 = inlined_call_operand.vmem [shape: bf16[2,32,96], index: 6, kind: input, shape index: {}]   ;;  %s5294_s7 = inlined_call_operand.vmem [shape: f32[2,1,96], index: 7, kind: input, shape index: {}]   ;;  %s5295_s8 = inlined_call_operand.vmem [shape: bf16[2,32,32], index: 8, kind: input, shape index: {}]   ;;  %s5296_s9 = inlined_call_operand.vmem [shape: f32[2,1,32], index: 9, kind: input, shape index: {}]   ;;  %s5297_s10 = inlined_call_operand.vmem [shape: bf16[2,32,2048], index: 10, kind: input, shape index: {}]   ;;  %s5298_s11 = inlined_call_operand.vmem [shape: f32[2,1,2048], index: 11, kind: input, shape index: {}]   ;;  %s5299_s12 = inlined_call_operand.vmem [shape: bf16[2,2048,32], index: 12, kind: input, shape index: {}]   ;;  %s5300_s13 = inlined_call_operand.vmem [shape: f32[2,1,32], index: 13, kind: input, shape index: {}]   ;;  %s5301_s14 = inlined_call_operand.vmem [shape: f32[2,1,32], index: 14, kind: input, shape index: {}]   ;;  %s5302_s15 = inlined_call_operand.vmem [shape: f32[2,1,32], index: 15, kind: input, shape index: {}]   ;;  %s5303_s16 = inlined_call_operand.vmem [shape: f32[2,1,32], index: 16, kind: input, shape index: {}]   ;;  %s5304_s17 = inlined_call_operand.vmem [shape: f32[2,1,32], index: 17, kind: input, shape index: {}]   ;;  %s5305_s18 = inlined_call_operand.vmem [shape: f32[8,4], index: 18, kind: output, shape index: {}]  }
   0x1   :  { %5311 = sst [smem:[#allocation5_spill]] %s5287_s0 }
   0x2   :  { %5312 = sst [smem:[#allocation6_spill]] %s5288_s1 }
   0x3   :  { %5313 = sst [smem:[#allocation7_spill]] %s5289_s2 }
   0x4   :  { %5314 = sst [smem:[#allocation8_spill]] %s5291_s4 }
   0x5   :  { %5315 = sst [smem:[#allocation9_spill]] %s5292_s5 }
   0x6   :  { %5316 = sst [smem:[#allocation10_spill]] %s5293_s6 }
   0x7   :  { %5317 = sst [smem:[#allocation11_spill]] %s5295_s8 }
   0x8   :  { %5318 = sst [smem:[#allocation12_spill]] %s5297_s10 }
   0x9   :  { %5319 = sst [smem:[#allocation13_spill]] %s5298_s11 }
   0xa   :  { %5320 = sst [smem:[#allocation14_spill]] %s5305_s18 }
   0xb LB: > { %5321 = sst [smem:[#allocation3_spill]] %s4583_s27  ;;  %s4701_s28 = sadd.s32 4294967295, %s4583_s27   ;;  %s4583_s27 = sphi %s4695_s27, %s28_s27  }
   0xc   : > { %p3598_p0 = scmp.ge.s32.totalorder %s4583_s27, 1  ;;  %p602_p1 = scmp.lt.s32.totalorder %s4583_s27, 3 }
   0xe   : > { %p603_p2 = pnand %p3598_p0, %p602_p1 }
  0x10   : > { %606 = sbr.rel (%p603_p2) target bundleno = 2712 (0xa98), region = 92 }
  0x15   : > { %p691_p3 = scmp.lt.s32.totalorder %s4701_s28, 1  ;;  %s5322_s6 = sld [smem:[#allocation10_spill]] }
  0x16   : > { %s5323_s8 = sld [smem:[#allocation11_spill]]  ;;  %p3608_p4 = scmp.ne.s32.totalorder %s4701_s28, 0 }
  0x17   : > { %s4707_s29 = scalar_select %p691_p3, %s4701_s28, 1 }
  0x18   : > { %s5325_s10 = sld [smem:[#allocation12_spill]] }
  0x19   : > { %s4314_s30 = sshll.u32 %s4707_s29, 4  ;;  %s4316_s18 = sshll.u32 %s4707_s29, 8 }
  0x1a   : > { %s5326_s11 = sld [smem:[#allocation13_spill]]  ;;  %s4317_s21 = sshll.u32 %s4707_s29, 10 }
  0x1b   : > { %s4717_s22 = scalar_lea.vmem %s5322_s6, %s4314_s30  ;;  %s723_s23 = scalar_lea.vmem %s5300_s13, %s4707_s29 }
  0x1c   : > { %s4722_s24 = scalar_lea.vmem %s5323_s8, %s4314_s30  ;;  %s4747_s25 = scalar_lea.vmem %s5299_s12, %s4317_s21 }
  0x1d   : > { %5324 = sst [smem:[#allocation4_spill]] %s4722_s24  ;;  %s726_s4 = scalar_lea.vmem %s5301_s14, %s4707_s29 }
  0x1e   : > { %s4732_s0 = scalar_lea.vmem %s5325_s10, %s4316_s18  ;;  %s729_s1 = scalar_lea.vmem %s5302_s15, %s4707_s29 }
  0x1f   : > { %s732_s10 = scalar_lea.vmem %s5303_s16, %s4707_s29  ;;  %s735_s2 = scalar_lea.vmem %s5304_s17, %s4707_s29 }
  0x20   : > { %s4737_s20 = scalar_lea.vmem %s5326_s11, %s4314_s30  ;;  %740 = sbr.rel (%p3608_p4) target bundleno = 175 (0xaf), region = 96 }
  0x21   : > { %s5327_s21 = sld [smem:[#allocation7_spill]] (!%p3608_p4) }
  0x22   : > { %s5328_s30 = sld [smem:[#allocation5_spill]] (!%p3608_p4) }
  0x23   : > { %s5329_s26 = sld [smem:[#allocation6_spill]] (!%p3608_p4) }
  0x25   : > { %vm749_vm0 = vcmask 130048   ;;  %v4507_v4 = vld [vmem:[%s5290_s3] ss:$0 sm:$0xff]  ;;  %vm782_vm1 = vcmask 261120  }
  0x27   : > { %v744_v0 = vld [vmem:[%s5327_s21 + $0x8] sm:$0xff]  ;;  %v743_v1 = vld [vmem:[%s5327_s21] sm:$0xff] }
  0x28   : > { %770 = vmatpush.msra.mxu0 %v744_v0  ;;  %4482 = vmatpush.msra.mxu1 %v744_v0  ;;  %v741_v2 = vld [vmem:[%s5328_s30] sm:$0xff]  ;;  %v742_v3 = vld [vmem:[%s5328_s30 + $0x8] sm:$0xff] }
  0x29   : > { %v779_v6 = vld [vmem:[%s5329_s26] sm:$0xff] }
  0x2a   : > { %771 = vmatpush.msra.mxu0 %v743_v1  ;;  %4483 = vmatpush.msra.mxu1 %v743_v1 }
  0x2b   : > { %3609 = vmatmul.msk.f32.vlgmr.msra.gmra.mxu0 %vm749_vm0, %v741_v2  ;;  %3610 = vmatmul.msk.f32.vlgmr.msra.gmra.mxu1 %vm749_vm0, %v742_v3 }
  0xa8   : > { %v773_v5 = vpop.f32.mrf.mxu0  ;;  %v776_v7 = vpop.f32.mrf.mxu1 }
  0xa9   : > { %v774_v8 = vadd.f32 %v4507_v4, %v773_v5  ;;  %v777_v9 = vadd.f32 %v4507_v4, %v776_v7 }
  0xab   : > { %v780_v10 = vadd.f32 %v779_v6, %v774_v8  ;;  %v781_v11 = vadd.f32 %v779_v6, %v777_v9 }
  0xad   : > { %783 = vst.msk [vmem:[#allocation2] sm:$0xff] %vm782_vm1, %v780_v10 }
  0xae   : > { %784 = vst.msk [vmem:[#allocation2 + $0x8] sm:$0xff] %vm782_vm1, %v781_v11 }
  0xaf PF: > { %v4319_v12 = vld [vmem:[%s4717_s22 + $0x8] sm:$0xff]  ;;  %v4318_v13 = vld [vmem:[%s4717_s22] sm:$0xff]  ;;  %vm808_vm2 = vcmask 261120   ;;  %s5330_s11 = scalar_lea.vmem %s5294_s7, %s4707_s29  ;;  %s4585_s22 = smov 112   ;;  %vm829_vm3 = vcmask 64512  }
  0xb0   : > { %818 = vmatpush.bf16.msra.mxu0 %v4319_v12  ;;  %v4523_v17 = vld [vmem:[%s5330_s11] ss:$0 sm:$0xff]  ;;  %s4586_s19 = smov 120   ;;  %s4587_s6 = smov 96  }
  0xb1   : > { %s4588_s8 = smov 80   ;;  %s4589_s24 = smov 88  }
  0xb2   : > { %s4590_s27 = smov 56   ;;  %s4591_s26 = smov 72  }
  0xb3   : > { %s4592_s5 = smov 64   ;;  %s4593_s18 = smov 104  }
  0xb4   : > { %v4786_v14 = vld [vmem:[#allocation2] sm:$0xff]  ;;  %819 = vmatpush.bf16.msra.mxu0 %v4318_v13  ;;  %s4594_s11 = smov 48   ;;  %p4309_p5 = scmp.ne.s32.totalorder %s4701_s28, 1 }
  0xb5   : > { %v4788_v15 = vld [vmem:[#allocation2 + $0x8] sm:$0xff] }
  0xb6   : > { %v787_v16 = vpack.c.bf16 %v4788_v15, %v4786_v14 }
  0xb8   : > { %3619 = vmatmul.msk.bf16.vlgmr.msra.gmra.mxu0 %vm808_vm2, %v787_v16 }
 0x135   : > { %v821_v18 = vpop.f32.mrf.mxu0 }
 0x136   : > { %v4798_v19 = vadd.f32 %v4523_v17, %v821_v18 }
 0x138   : > { %982 = vrot.lane.b32.xlu2 %v4798_v19, %s4585_s22  ;;  %904 = vrot.lane.b32.xlu1 %v4798_v19, %s4586_s19 }
 0x139   : > { %827 = vrot.lane.b32.xlu0 %v4798_v19, %s4587_s6 }
 0x13d   : > { %v823_v25 = vpop.f32.mrf.mxu0 }
 0x13e   : > { %v4823_v32 = vadd.f32 %v4523_v17, %v823_v25 }
 0x140   : > { %984 = vrot.lane.b32.xlu1 %v4798_v19, %s4588_s8 }
 0x141   : > { %906 = vrot.lane.b32.xlu0 %v4798_v19, %s4589_s24 }
 0x192   : > { %v983_v24 = vpop.permute.xlu2 %982 }
 0x1aa   : > { %v905_v20 = vpop.permute.xlu1 %904 }
 0x1ab   : > { %v828_v21 = vpop.permute.xlu0 %827 }
 0x1ac   : > { %3620 = vmatpush.xpose.msk.msra.mxu1 %vm829_vm3, %v828_v21 }
 0x1af   : > { %3621 = vmatmul.msk.f32.vlgmr.msra.gmra.mxu1 %vm829_vm3, %v4798_v19 }
 0x1b2   : > { %v985_v22 = vpop.permute.xlu1 %984 }
 0x1b3   : > { %v907_v23 = vpop.permute.xlu0 %906  ;;  %3626 = vmatpush.xpose.msk.msrb.mxu1 %vm829_vm3, %v985_v22 }
 0x1b4   : > { %3623 = vmatpush.xpose.msk.msrb.mxu0 %vm829_vm3, %v907_v23 }
 0x1b7   : > { %3624 = vmatmul.msk.f32.vlgmr.msrb.gmra.mxu0 %vm829_vm3, %v905_v20  ;;  %3627 = vmatmul.msk.f32.vlgmr.msrb.gmra.mxu1 %vm829_vm3, %v983_v24 }
 0x22c   : > { %v851_v26 = vpop.f32.mrf.mxu1 }
 0x22d   : > { %v854_v27 = vsel %vm829_vm3, %v851_v26, -inf }
 0x22e   : > { %855 = vmax.xlane.f32.xlu2 %v854_v27 }
 0x234   : > { %v929_v28 = vpop.f32.mrf.mxu0  ;;  %v1007_v29 = vpop.f32.mrf.mxu1 }
 0x235   : > { %v1010_v30 = vsel %vm829_vm3, %v1007_v29, -inf  ;;  %v932_v31 = vsel %vm829_vm3, %v929_v28, -inf }
 0x236   : > { %1011 = vmax.xlane.f32.xlu1 %v1010_v30  ;;  %933 = vmax.xlane.f32.xlu0 %v932_v31 }
 0x246   : > { %956 = vrot.lane.b32.xlu2 %v4798_v19, %s4590_s27 }
 0x24a   : > { %1062 = vrot.lane.b32.xlu0 %v4798_v19, %s4591_s26 }
 0x24e   : > { %1156 = vrot.lane.b32.xlu2 %v4823_v32, %s4587_s6  ;;  %s4596_s6 = smov 16  }
 0x24f   : > { %878 = vrot.lane.b32.xlu1 %v4798_v19, %s4592_s5 }
 0x252   : > { %1060 = vrot.lane.b32.xlu0 %v4798_v19, %s4593_s18 }
 0x257   : > { %1034 = vrot.lane.b32.xlu1 %v4798_v19, %s4594_s11 }
 0x25a   : > { %1232 = vrot.lane.b32.xlu0 %v4823_v32, %s4586_s19  ;;  %s5331_s19 = sld [smem:[#allocation4_spill]] }
 0x25f   : > { %1234 = vrot.lane.b32.xlu1 %v4823_v32, %s4589_s24  ;;  %s4598_s24 = smov 24  }
 0x267   : > { %1390 = vrot.lane.b32.xlu1 %v4823_v32, %s4591_s26 }
 0x2a1   : > { %v856_v33 = vpop.xlane.xlu2 %855 }
 0x2a2   : > { %v857_v34 = vsub.f32 %v851_v26, %v856_v33 }
 0x2a4   : > { %v858_v35 = vmul.f32 1.442695, %v857_v34 }
 0x2a6   : > { %4530 = vpow2.f32 %v858_v35 }
 0x2a9   : > { %v1012_v36 = vpop.xlane.xlu1 %1011  ;;  %v934_v38 = vpop.xlane.xlu0 %933 }
 0x2aa   : > { %v1013_v37 = vsub.f32 %v1007_v29, %v1012_v36  ;;  %v935_v39 = vsub.f32 %v929_v28, %v934_v38  ;;  %v957_v48 = vpop.permute.xlu2 %956 }
 0x2ac   : > { %v4531_v40 = vpop.eup %4530  ;;  %v1014_v41 = vmul.f32 1.442695, %v1013_v37  ;;  %v936_v42 = vmul.f32 1.442695, %v935_v39 }
 0x2ad   : > { %v860_v43 = vsel %vm829_vm3, %v4531_v40, 0.0 }
 0x2ae   : > { %4532 = vpow2.f32 %v1014_v41  ;;  %861 = vadd.xlane.f32.xlu2 %v860_v43 }
 0x2af   : > { %4534 = vpow2.f32 %v936_v42 }
 0x2b2   : > { %v1157_v51 = vpop.permute.xlu2 %1156 }
 0x2b4   : > { %v4839_v44 = vpop.eup %4532 }
 0x2b5   : > { %v4841_v45 = vpop.eup %4534  ;;  %v1016_v46 = vsel %vm829_vm3, %v4839_v44, 0.0 }
 0x2b6   : > { %1017 = vadd.xlane.f32.xlu0 %v1016_v46  ;;  %v938_v47 = vsel %vm829_vm3, %v4841_v45, 0.0 }
 0x2b7   : > { %939 = vadd.xlane.f32.xlu2 %v938_v47 }
 0x2bc   : > { %v1063_v52 = vpop.permute.xlu0 %1062 }
 0x2c1   : > { %v879_v49 = vpop.permute.xlu1 %878 }
 0x2c2   : > { %899 = vmatpush.msra.mxu2 %v879_v49 }
 0x2c4   : > { %977 = vmatpush.msrb.mxu2 %v957_v48  ;;  %v4854_v53 = vpop.permute.xlu0 %1060 }
 0x2c9   : > { %v1035_v50 = vpop.permute.xlu1 %1034 }
 0x2ca   : > { %1055 = vmatpush.msra.mxu3 %v1035_v50  ;;  %1310 = vrot.lane.b32.xlu0 %v4823_v32, %s4585_s22  ;;  %s4595_s22 = smov 40  }
 0x2cc   : > { %3632 = vmatpush.xpose.msk.msrb.mxu3 %vm829_vm3, %v1157_v51  ;;  %v4856_v54 = vpop.permute.xlu0 %1232 }
 0x2cf   : > { %1312 = vrot.lane.b32.xlu2 %v4823_v32, %s4588_s8  ;;  %s4597_s8 = smov 8  }
 0x2d1   : > { %v1235_v29 = vpop.permute.xlu1 %1234 }
 0x2d7   : > { %1388 = vrot.lane.b32.xlu2 %v4823_v32, %s4593_s18 }
 0x2d9   : > { %v1391_v33 = vpop.permute.xlu1 %1390 }
 0x321   : > { %v862_v55 = vpop.xlane.xlu2 %861 }
 0x322   : > { %4536 = vrcp.f32 %v862_v55  ;;  %v874_v61 = vand.u32 2147483648, %v862_v55  ;;  %v872_v63 = vand.u32 2147483647, %v862_v55  ;;  %vm868_vm5 = vweird.f32 %v862_v55 }
 0x324   : > { %v875_v2 = vor.u32 1.1754944e-38, %v874_v61  ;;  %vm873_vm7 = vcmp.eq.f32.partialorder %v872_v63, 8.507059e+37 }
 0x328   : > { %v4537_v56 = vpop.eup %4536 }
 0x329   : > { %v864_v57 = vmul.f32 %v4537_v56, %v862_v55  ;;  %v1018_v58 = vpop.xlane.xlu0 %1017  ;;  %vm869_vm4 = vweird.f32 %v4537_v56 }
 0x32a   : > { %v940_v59 = vpop.xlane.xlu2 %939  ;;  %4538 = vrcp.f32 %v1018_v58  ;;  %vm870_vm6 = vmor %vm868_vm5, %vm869_vm4  ;;  %v1030_v11 = vand.u32 2147483648, %v1018_v58  ;;  %v1028_v16 = vand.u32 2147483647, %v1018_v58  ;;  %vm1024_vm10 = vweird.f32 %v1018_v58 }
 0x32b   : > { %v865_v60 = vsub.f32 1.0, %v864_v57  ;;  %4540 = vrcp.f32 %v940_v59  ;;  %v952_v12 = vand.u32 2147483648, %v940_v59  ;;  %v950_v18 = vand.u32 2147483647, %v940_v59 }
 0x32c   : > { %vm946_vm11 = vweird.f32 %v940_v59  ;;  %v1031_v22 = vor.u32 1.1754944e-38, %v1030_v11  ;;  %vm1029_vm14 = vcmp.eq.f32.partialorder %v1028_v16, 8.507059e+37 }
 0x32d   : > { %v866_v62 = vmul.f32 %v4537_v56, %v865_v60  ;;  %v953_v23 = vor.u32 1.1754944e-38, %v952_v12  ;;  %vm951_vm15 = vcmp.eq.f32.partialorder %v950_v18, 8.507059e+37 }
 0x32f   : > { %v867_v0 = vadd.f32 %v4537_v56, %v866_v62 }
 0x330   : > { %v4539_v1 = vpop.eup %4538 }
 0x331   : > { %v4541_v3 = vpop.eup %4540  ;;  %v1020_v4 = vmul.f32 %v4539_v1, %v1018_v58  ;;  %v871_v5 = vsel %vm870_vm6, %v4537_v56, %v867_v0  ;;  %vm1025_vm8 = vweird.f32 %v4539_v1 }
 0x332   : > { %v942_v6 = vmul.f32 %v4541_v3, %v940_v59  ;;  %v876_v7 = vsel %vm873_vm7, %v875_v2, %v871_v5  ;;  %vm947_vm9 = vweird.f32 %v4541_v3  ;;  %vm1026_vm12 = vmor %vm1024_vm10, %vm1025_vm8  ;;  %v1313_v31 = vpop.permute.xlu2 %1312 }
 0x333   : > { %v1021_v8 = vsub.f32 1.0, %v1020_v4  ;;  %v877_v9 = vmul.f32 %v4531_v40, %v876_v7  ;;  %vm948_vm13 = vmor %vm946_vm11, %vm947_vm9 }
 0x334   : > { %v943_v10 = vsub.f32 1.0, %v942_v6 }
 0x335   : > { %v1022_v13 = vmul.f32 %v4539_v1, %v1021_v8  ;;  %3622 = vmatmul.msk.f32.vlgmr.msra.gmra.mxu2 %vm829_vm3, %v877_v9 }
 0x336   : > { %v944_v17 = vmul.f32 %v4541_v3, %v943_v10  ;;  %3629 = vmatpush.xpose.msk.msra.mxu2 %vm829_vm3, %v1063_v52 }
 0x337   : > { %v1023_v20 = vadd.f32 %v4539_v1, %v1022_v13 }
 0x338   : > { %v945_v21 = vadd.f32 %v4541_v3, %v944_v17 }
 0x339   : > { %v1027_v24 = vsel %vm1026_vm12, %v4539_v1, %v1023_v20 }
 0x33a   : > { %v949_v25 = vsel %vm948_vm13, %v4541_v3, %v945_v21  ;;  %v1032_v26 = vsel %vm1029_vm14, %v1031_v22, %v1027_v24  ;;  %v1389_v35 = vpop.permute.xlu2 %1388 }
 0x33b   : > { %v954_v27 = vsel %vm951_vm15, %v953_v23, %v949_v25  ;;  %v1033_v28 = vmul.f32 %v4839_v44, %v1032_v26 }
 0x33c   : > { %v955_v30 = vmul.f32 %v4841_v45, %v954_v27  ;;  %v1311_v34 = vpop.permute.xlu0 %1310 }
 0x33d   : > { %3628 = vmatmul.msk.f32.vlgmr.msra.gmra.mxu3 %vm829_vm3, %v1033_v28 }
 0x33e   : > { %3625 = vmatmul.msk.f32.vlgmr.msrb.gmra.mxu2 %vm829_vm3, %v955_v30  ;;  %3638 = vmatpush.xpose.msk.msra.mxu3 %vm829_vm3, %v1313_v31 }
 0x33f   : > { %3635 = vmatpush.xpose.msk.msrb.mxu2 %vm829_vm3, %v1235_v29 }
 0x345   : > { %3633 = vmatmul.msk.f32.vlgmr.msrb.gmra.mxu3 %vm829_vm3, %v4823_v32 }
 0x346   : > { %3630 = vmatmul.msk.f32.vlgmr.msra.gmra.mxu2 %vm829_vm3, %v4854_v53 }
 0x347   : > { %3641 = vmatpush.xpose.msk.msra.mxu2 %vm829_vm3, %v1391_v33 }
 0x34d   : > { %3639 = vmatmul.msk.f32.vlgmr.msra.gmra.mxu3 %vm829_vm3, %v1311_v34 }
 0x34e   : > { %3636 = vmatmul.msk.f32.vlgmr.msrb.gmra.mxu2 %vm829_vm3, %v4856_v54 }
 0x356   : > { %3642 = vmatmul.msk.f32.vlgmr.msra.gmra.mxu2 %vm829_vm3, %v1389_v35 }
 0x3b8   : > { %v4875_v36 = vpop.f32.mrf.mxu2 }
 0x3c0   : > { %v4877_v37 = vpop.f32.mrf.mxu3 }
 0x3c1   : > { %v4879_v38 = vpop.f32.mrf.mxu2 }
 0x3c8   : > { %v1179_v39 = vpop.f32.mrf.mxu3 }
 0x3c9   : > { %v1085_v40 = vpop.f32.mrf.mxu2  ;;  %v1182_v41 = vsel %vm829_vm3, %v1179_v39, -inf }
 0x3ca   : > { %v1088_v42 = vsel %vm829_vm3, %v1085_v40, -inf  ;;  %1183 = vmax.xlane.f32.xlu0 %v1182_v41 }
 0x3cb   : > { %1089 = vmax.xlane.f32.xlu1 %v1088_v42 }
 0x3d0   : > { %v1335_v43 = vpop.f32.mrf.mxu3 }
 0x3d1   : > { %v1257_v44 = vpop.f32.mrf.mxu2  ;;  %v1338_v45 = vsel %vm829_vm3, %v1335_v43, -inf }
 0x3d2   : > { %v1260_v46 = vsel %vm829_vm3, %v1257_v44, -inf }
 0x3d3   : > { %1261 = vmax.xlane.f32.xlu2 %v1260_v46  ;;  %1339 = vmax.xlane.f32.xlu1 %v1338_v45 }
 0x3d9   : > { %v1413_v47 = vpop.f32.mrf.mxu2 }
 0x3da   : > { %v1416_v48 = vsel %vm829_vm3, %v1413_v47, -inf }
 0x3db   : > { %1417 = vmax.xlane.f32.xlu0 %v1416_v48 }
 0x3eb   : > { %1206 = vrot.lane.b32.xlu2 %v4823_v32, %s4592_s5  ;;  %s5332_s5 = scalar_lea.vmem %s5296_s9, %s4707_s29 }
 0x3ef   : > { %1112 = vrot.lane.b32.xlu0 %v4798_v19, %s4595_s22 }
 0x43d   : > { %v1184_v49 = vpop.xlane.xlu0 %1183 }
 0x43e   : > { %v1090_v50 = vpop.xlane.xlu1 %1089  ;;  %v1185_v51 = vsub.f32 %v1179_v39, %v1184_v49 }
 0x43f   : > { %v1091_v52 = vsub.f32 %v1085_v40, %v1090_v50 }
 0x440   : > { %v1186_v53 = vmul.f32 1.442695, %v1185_v51 }
 0x441   : > { %v1092_v54 = vmul.f32 1.442695, %v1091_v52 }
 0x442   : > { %4542 = vpow2.f32 %v1186_v53 }
 0x443   : > { %4544 = vpow2.f32 %v1092_v54 }
 0x446   : > { %v1262_v55 = vpop.xlane.xlu2 %1261  ;;  %v1340_v56 = vpop.xlane.xlu1 %1339 }
 0x447   : > { %v1263_v57 = vsub.f32 %v1257_v44, %v1262_v55  ;;  %v1341_v58 = vsub.f32 %v1335_v43, %v1340_v56 }
 0x448   : > { %v4890_v59 = vpop.eup %4542 }
 0x449   : > { %v4892_v60 = vpop.eup %4544  ;;  %v1264_v61 = vmul.f32 1.442695, %v1263_v57  ;;  %v1342_v62 = vmul.f32 1.442695, %v1341_v58  ;;  %v1188_v19 = vsel %vm829_vm3, %v4890_v59, 0.0 }
 0x44a   : > { %v1094_v63 = vsel %vm829_vm3, %v4892_v60, 0.0  ;;  %1189 = vadd.xlane.f32.xlu1 %v1188_v19 }
 0x44b   : > { %4546 = vpow2.f32 %v1264_v61  ;;  %1095 = vadd.xlane.f32.xlu2 %v1094_v63 }
 0x44c   : > { %4548 = vpow2.f32 %v1342_v62 }
 0x44e   : > { %v1207_v0 = vpop.permute.xlu2 %1206  ;;  %v1418_v1 = vpop.xlane.xlu0 %1417 }
 0x44f   : > { %v1419_v2 = vsub.f32 %v1413_v47, %v1418_v1  ;;  %1227 = vmatpush.msra.mxu0 %v1207_v0 }
 0x451   : > { %v4898_v3 = vpop.eup %4546  ;;  %v1420_v4 = vmul.f32 1.442695, %v1419_v2 }
 0x452   : > { %v4900_v5 = vpop.eup %4548  ;;  %v1266_v6 = vsel %vm829_vm3, %v4898_v3, 0.0 }
 0x453   : > { %4550 = vpow2.f32 %v1420_v4  ;;  %1267 = vadd.xlane.f32.xlu0 %v1266_v6  ;;  %v1344_v7 = vsel %vm829_vm3, %v4900_v5, 0.0 }
 0x454   : > { %1345 = vadd.xlane.f32.xlu2 %v1344_v7 }
 0x459   : > { %v4906_v8 = vpop.eup %4550 }
 0x45a   : > { %v1422_v9 = vsel %vm829_vm3, %v4906_v8, 0.0 }
 0x45b   : > { %1423 = vadd.xlane.f32.xlu1 %v1422_v9 }
 0x461   : > { %v1113_v10 = vpop.permute.xlu0 %1112 }
 0x462   : > { %1133 = vmatpush.msra.mxu1 %v1113_v10 }
 0x467   : > { %1362 = vrot.lane.b32.xlu0 %v4823_v32, %s4594_s11  ;;  %s5334_s11 = sld [smem:[#allocation9_spill]] (!%p4309_p5) }
 0x46c   : > { %1440 = vrot.lane.b32.xlu2 %v4823_v32, %s4595_s22 }
 0x474   : > { %1284 = vrot.lane.b32.xlu1 %v4823_v32, %s4590_s27 }
 0x4bd   : > { %v1190_v11 = vpop.xlane.xlu1 %1189 }
 0x4be   : > { %v1096_v12 = vpop.xlane.xlu2 %1095  ;;  %4552 = vrcp.f32 %v1190_v11  ;;  %v1202_v24 = vand.u32 2147483648, %v1190_v11  ;;  %v1200_v32 = vand.u32 2147483647, %v1190_v11  ;;  %vm1196_vm4 = vweird.f32 %v1190_v11 }
 0x4bf   : > { %4554 = vrcp.f32 %v1096_v12  ;;  %v1108_v25 = vand.u32 2147483648, %v1096_v12  ;;  %v1106_v28 = vand.u32 2147483647, %v1096_v12  ;;  %vm1102_vm5 = vweird.f32 %v1096_v12 }
 0x4c0   : > { %v1203_v31 = vor.u32 1.1754944e-38, %v1202_v24  ;;  %vm1201_vm8 = vcmp.eq.f32.partialorder %v1200_v32, 8.507059e+37  ;;  %v4320_v32 = vld [vmem:[%s5331_s19] sm:$0xff] }
 0x4c1   : > { %v1109_v34 = vor.u32 1.1754944e-38, %v1108_v25  ;;  %vm1107_vm9 = vcmp.eq.f32.partialorder %v1106_v28, 8.507059e+37 }
 0x4c4   : > { %v4553_v13 = vpop.eup %4552 }
 0x4c5   : > { %v4555_v16 = vpop.eup %4554  ;;  %v1192_v17 = vmul.f32 %v4553_v13, %v1190_v11  ;;  %vm1197_vm0 = vweird.f32 %v4553_v13 }
 0x4c6   : > { %v1098_v18 = vmul.f32 %v4555_v16, %v1096_v12  ;;  %v4916_v20 = vpop.xlane.xlu0 %1267  ;;  %vm1103_vm1 = vweird.f32 %v4555_v16  ;;  %vm1198_vm6 = vmor %vm1196_vm4, %vm1197_vm0 }
 0x4c7   : > { %v1193_v21 = vsub.f32 1.0, %v1192_v17  ;;  %v1346_v22 = vpop.xlane.xlu2 %1345  ;;  %4556 = vrcp.f32 %v4916_v20  ;;  %vm1104_vm7 = vmor %vm1102_vm5, %vm1103_vm1  ;;  %v1280_v63 = vand.u32 2147483648, %v4916_v20  ;;  %vm1274_vm15 = vweird.f32 %v4916_v20 }
 0x4c8   : > { %v1099_v23 = vsub.f32 1.0, %v1098_v18  ;;  %4558 = vrcp.f32 %v1346_v22  ;;  %v1358_v49 = vand.u32 2147483648, %v1346_v22  ;;  %v1356_v51 = vand.u32 2147483647, %v1346_v22 }
 0x4c9   : > { %v1194_v26 = vmul.f32 %v4553_v13, %v1193_v21  ;;  %vm1352_vm11 = vweird.f32 %v1346_v22  ;;  %v1278_v0 = vand.u32 2147483647, %v4916_v20  ;;  %v1281_v4 = vor.u32 1.1754944e-38, %v1280_v63 }
 0x4ca   : > { %v1100_v27 = vmul.f32 %v4555_v16, %v1099_v23  ;;  %v1359_v55 = vor.u32 1.1754944e-38, %v1358_v49  ;;  %vm1357_vm13 = vcmp.eq.f32.partialorder %v1356_v51, 8.507059e+37 }
 0x4cb   : > { %v1195_v29 = vadd.f32 %v4553_v13, %v1194_v26  ;;  %vm1279_vm1 = vcmp.eq.f32.partialorder %v1278_v0, 8.507059e+37 }
 0x4cc   : > { %v1101_v30 = vadd.f32 %v4555_v16, %v1100_v27 }
 0x4cd   : > { %v4557_v33 = vpop.eup %4556  ;;  %v1199_v35 = vsel %vm1198_vm6, %v4553_v13, %v1195_v29 }
 0x4ce   : > { %v4559_v39 = vpop.eup %4558  ;;  %v1105_v40 = vsel %vm1104_vm7, %v4555_v16, %v1101_v30  ;;  %v1204_v41 = vsel %vm1201_vm8, %v1203_v31, %v1199_v35  ;;  %v1424_v42 = vpop.xlane.xlu1 %1423  ;;  %v1270_v45 = vmul.f32 %v4557_v33, %v4916_v20  ;;  %vm1275_vm14 = vweird.f32 %v4557_v33 }
 0x4cf   : > { %v1110_v43 = vsel %vm1107_vm9, %v1109_v34, %v1105_v40  ;;  %v1348_v44 = vmul.f32 %v4559_v39, %v1346_v22  ;;  %4560 = vrcp.f32 %v1424_v42  ;;  %v1205_v48 = vmul.f32 %v4890_v59, %v1204_v41  ;;  %vm1276_vm0 = vmor %vm1274_vm15, %vm1275_vm14  ;;  %v1441_v12 = vpop.permute.xlu2 %1440 }
 0x4d0   : > { %v1111_v47 = vmul.f32 %v4892_v60, %v1110_v43  ;;  %vm1353_vm10 = vweird.f32 %v4559_v39  ;;  %v1271_v52 = vsub.f32 1.0, %v1270_v45  ;;  %vm1430_vm5 = vweird.f32 %v1424_v42  ;;  %v4524_v45 = vld [vmem:[%s5332_s5] ss:$0 sm:$0xff] }
 0x4d1   : > { %v1349_v46 = vsub.f32 1.0, %v1348_v44  ;;  %3634 = vmatmul.msk.f32.vlgmr.msra.gmra.mxu0 %vm829_vm3, %v1205_v48  ;;  %vm1354_vm12 = vmor %vm1352_vm11, %vm1353_vm10  ;;  %v1434_v9 = vand.u32 2147483647, %v1424_v42  ;;  %vm1151_vm8 = vcmask 130048   ;;  %vm1153_vm9 = vcmask 195584  }
 0x4d2   : > { %3631 = vmatmul.msk.f32.vlgmr.msra.gmra.mxu1 %vm829_vm3, %v1111_v47  ;;  %v1272_v58 = vmul.f32 %v4557_v33, %v1271_v52 }
 0x4d3   : > { %v1350_v50 = vmul.f32 %v4559_v39, %v1349_v46  ;;  %vm1435_vm7 = vcmp.eq.f32.partialorder %v1434_v9, 8.507059e+37 }
 0x4d4   : > { %v1273_v62 = vadd.f32 %v4557_v33, %v1272_v58 }
 0x4d5   : > { %v4561_v53 = vpop.eup %4560  ;;  %v1351_v54 = vadd.f32 %v4559_v39, %v1350_v50 }
 0x4d6   : > { %v1426_v60 = vmul.f32 %v4561_v53, %v1424_v42  ;;  %v1277_v1 = vsel %vm1276_vm0, %v4557_v33, %v1273_v62  ;;  %vm1431_vm4 = vweird.f32 %v4561_v53 }
 0x4d7   : > { %v1355_v56 = vsel %vm1354_vm12, %v4559_v39, %v1351_v54  ;;  %v1282_v6 = vsel %vm1279_vm1, %v1281_v4, %v1277_v1  ;;  %vm1432_vm6 = vmor %vm1430_vm5, %vm1431_vm4  ;;  %v3719_v4 = vld [vmem:[%s4732_s0 + $0x80] sm:$0xf] }
 0x4d8   : > { %v1360_v57 = vsel %vm1357_vm13, %v1359_v55, %v1355_v56  ;;  %v1427_v19 = vsub.f32 1.0, %v1426_v60  ;;  %v1283_v11 = vmul.f32 %v4898_v3, %v1282_v6  ;;  %v4346_v6 = vld [vmem:[%s4732_s0 + $0xbc] sm:$0xf0] }
 0x4d9   : > { %v1363_v59 = vpop.permute.xlu0 %1362  ;;  %v1361_v61 = vmul.f32 %v4900_v5, %v1360_v57  ;;  %v1436_v5 = vand.u32 2147483648, %v1424_v42  ;;  %v3720_v9 = vor.u32 %v4346_v6, %v3719_v4 }
 0x4da   : > { %1383 = vmatpush.msrb.mxu0 %v1363_v59  ;;  %v1428_v2 = vmul.f32 %v4561_v53, %v1427_v19 }
 0x4db   : > { %3640 = vmatmul.msk.f32.vlgmr.msrb.gmra.mxu0 %vm829_vm3, %v1361_v61  ;;  %v1437_v16 = vor.u32 1.1754944e-38, %v1436_v5 }
 0x4dc   : > { %v1429_v7 = vadd.f32 %v4561_v53, %v1428_v2  ;;  %1822 = vmatpush.bf16.msra.mxu0 %v3720_v9 }
 0x4de   : > { %v1433_v13 = vsel %vm1432_vm6, %v4561_v53, %v1429_v7  ;;  %v4599_v53 = vmov 32.0   ;;  %v4338_v7 = vld [vmem:[%s4732_s0 + $0x84] sm:$0xf] }
 0x4df   : > { %v1438_v17 = vsel %vm1435_vm7, %v1437_v16, %v1433_v13  ;;  %4562 = vrcp.f32 %v4599_v53 }
 0x4e0   : > { %v1439_v18 = vmul.f32 %v4906_v8, %v1438_v17  ;;  %v4321_v8 = vld [vmem:[%s5331_s19 + $0x8] sm:$0xff] }
 0x4e1   : > { %1511 = vmatpush.bf16.msrb.mxu3 %v4321_v8  ;;  %v3663_v8 = vld [vmem:[%s4732_s0 + $0x8] sm:$0xf] }
 0x4e5   : > { %1512 = vmatpush.bf16.msrb.mxu3 %v4320_v32  ;;  %v4563_v54 = vpop.eup %4562 }
 0x4e6   : > { %v1285_v10 = vpop.permute.xlu1 %1284  ;;  %v1530_v55 = vmul.f32 32.0, %v4563_v54 }
 0x4e7   : > { %1305 = vmatpush.msrb.mxu1 %v1285_v10  ;;  %v3721_v10 = vld [vmem:[%s4732_s0 + $0xc0] sm:$0xf0] }
 0x4e8   : > { %3637 = vmatmul.msk.f32.vlgmr.msrb.gmra.mxu1 %vm829_vm3, %v1283_v11  ;;  %v1531_v56 = vsub.f32 1.0, %v1530_v55  ;;  %v3727_v11 = vld [vmem:[%s4732_s0 + $0x88] sm:$0xf]  ;;  %v3724_v16 = vor.u32 %v4338_v7, %v3721_v10  ;;  %v3679_v55 = vld [vmem:[%s4732_s0 + $0x18] sm:$0xf] }
 0x4e9   : > { %1461 = vmatpush.msra.mxu1 %v1441_v12  ;;  %v4347_v12 = vld [vmem:[%s4732_s0 + $0xc4] sm:$0xf0]  ;;  %v4525_v10 = vld [vmem:[%s726_s4] ss:$0 sm:$0xff] }
 0x4ea   : > { %v1532_v57 = vmul.f32 %v4563_v54, %v1531_v56  ;;  %v3728_v17 = vor.u32 %v4347_v12, %v3727_v11  ;;  %1836 = vmatpush.bf16.msrb.mxu2 %v3724_v16  ;;  %v4333_v56 = vld [vmem:[%s4732_s0 + $0x54] sm:$0xf0]  ;;  %v4526_v16 = vld [vmem:[%s729_s1] ss:$0 sm:$0xff] }
 0x4ec   : > { %v1533_v58 = vadd.f32 %v4563_v54, %v1532_v57  ;;  %1850 = vmatpush.bf16.msrb.mxu1 %v3728_v17 }
 0x4f0   : > { %3643 = vmatmul.msk.f32.vlgmr.msra.gmra.mxu1 %vm829_vm3, %v1439_v18  ;;  %v4339_v18 = vld [vmem:[%s4732_s0 + $0x8c] sm:$0xf] }
 0x54e   : > { %v1229_v20 = vpop.f32.mrf.mxu0 }
 0x54f   : > { %v1135_v22 = vpop.f32.mrf.mxu1 }
 0x558   : > { %v1385_v21 = vpop.f32.mrf.mxu0 }
 0x559   : > { %v4513_v3 = vpack.i.bf16 %v1385_v21, %v4877_v37 }
 0x55b   : > { %4514 = vrot.lane.b32.xlu1 %v4513_v3, %s4596_s6 }
 0x565   : > { %v1307_v23 = vpop.f32.mrf.mxu1 }
 0x566   : > { %v4508_v24 = vpack.i.bf16 %v1307_v23, %v4879_v38  ;;  %v4330_v23 = vld [vmem:[%s4732_s0 + $0x3c] sm:$0xf0] }
 0x568   : > { %4509 = vrot.lane.b32.xlu0 %v4508_v24, %s4597_s8 }
 0x56d   : > { %v1463_v25 = vpop.f32.mrf.mxu1 }
 0x56e   : > { %v4518_v26 = vpack.i.bf16 %v1463_v25, %v1135_v22  ;;  %v3655_v22 = vld [vmem:[%s4732_s0] sm:$0xf]  ;;  %v4322_v25 = vld [vmem:[%s4732_s0 + $0x4] sm:$0xf] }
 0x56f   : > { %v3656_v24 = vor.u32 %v4330_v23, %v3655_v22  ;;  %v3753_v22 = vld [vmem:[%s4732_s0 + $0xe0] sm:$0xf0]  ;;  %v3759_v23 = vld [vmem:[%s4732_s0 + $0xa8] sm:$0xf] }
 0x570   : > { %4519 = vrot.lane.b32.xlu2 %v4518_v26, %s4598_s24  ;;  %v3657_v26 = vld [vmem:[%s4732_s0 + $0x40] sm:$0xf0] }
 0x571   : > { %v3660_v32 = vor.u32 %v4322_v25, %v3657_v26  ;;  %1823 = vmatpush.bf16.msra.mxu0 %v3656_v24  ;;  %v4351_v26 = vld [vmem:[%s4732_s0 + $0xe4] sm:$0xf0] }
 0x573   : > { %1837 = vmatpush.bf16.msrb.mxu2 %v3660_v32 }
 0x5ca   : > { %v4520_v28 = vpop.permute.xlu2 %4519 }
 0x5cb   : > { %v4522_v38 = vunpack.i.h.bf16 %v4520_v28  ;;  %v4521_v34 = vunpack.i.l.bf16 %v4520_v28  ;;  %v4323_v28 = vld [vmem:[%s4732_s0 + $0xc] sm:$0xf] }
 0x5cd   : > { %v4515_v27 = vpop.permute.xlu1 %4514 }
 0x5ce   : > { %v4517_v31 = vunpack.i.h.bf16 %v4515_v27  ;;  %v4516_v33 = vunpack.i.l.bf16 %v4515_v27  ;;  %v4331_v27 = vld [vmem:[%s4732_s0 + $0x44] sm:$0xf0] }
 0x5da   : > { %v4510_v29 = vpop.permute.xlu0 %4509 }
 0x5db   : > { %v4512_v37 = vunpack.i.h.bf16 %v4510_v29  ;;  %v4511_v30 = vunpack.i.l.bf16 %v4510_v29  ;;  %v3665_v29 = vld [vmem:[%s4732_s0 + $0x48] sm:$0xf0] }
 0x5dd   : > { %v1478_v35 = vsel %vm829_vm3, %v1229_v20, %v4512_v37  ;;  %v1150_v39 = vsel %vm829_vm3, %v4875_v36, %v4511_v30  ;;  %vm1534_vm3 = vweird.f32 %v4563_v54  ;;  %v3729_v20 = vld [vmem:[%s4732_s0 + $0xc8] sm:$0xf0]  ;;  %v3664_v37 = vor.u32 %v4331_v27, %v3663_v8 }
 0x5de   : > { %v1479_v40 = vsel %vm1151_vm8, %v1478_v35, %v4517_v31  ;;  %v1152_v41 = vsel %vm1151_vm8, %v1150_v39, %v4516_v33  ;;  %v3732_v21 = vor.u32 %v4339_v18, %v3729_v20  ;;  %v3668_v30 = vor.u32 %v4323_v28, %v3665_v29  ;;  %v3735_v33 = vld [vmem:[%s4732_s0 + $0x90] sm:$0xf]  ;;  %v4343_v8 = vld [vmem:[%s4732_s0 + $0xac] sm:$0xf]  ;;  %v3687_v29 = vld [vmem:[%s4732_s0 + $0x20] sm:$0xf] }
 0x5df   : > { %v1480_v42 = vsel %vm1153_vm9, %v1479_v40, %v4522_v38  ;;  %v1154_v43 = vsel %vm1153_vm9, %v1152_v41, %v4521_v34  ;;  %1851 = vmatpush.bf16.msrb.mxu1 %v3664_v37  ;;  %v4348_v38 = vld [vmem:[%s4732_s0 + $0xcc] sm:$0xf0]  ;;  %v4340_v34 = vld [vmem:[%s4732_s0 + $0x94] sm:$0xf]  ;;  %v3743_v41 = vld [vmem:[%s4732_s0 + $0x98] sm:$0xf] }
 0x5e0   : > { %v1481_v44 = vpack.c.bf16 %v1480_v42, %v1154_v43  ;;  %1864 = vmatpush.bf16.msra.mxu3 %v3732_v21  ;;  %v3736_v39 = vor.u32 %v4348_v38, %v3735_v33  ;;  %v3737_v40 = vld [vmem:[%s4732_s0 + $0xd0] sm:$0xf0]  ;;  %v4349_v42 = vld [vmem:[%s4732_s0 + $0xd4] sm:$0xf0]  ;;  %v3751_v21 = vld [vmem:[%s4732_s0 + $0xa0] sm:$0xf] }
 0x5e1   : > { %v3740_v43 = vor.u32 %v4340_v34, %v3737_v40  ;;  %v4334_v37 = vld [vmem:[%s4732_s0 + $0x5c] sm:$0xf0]  ;;  %v4326_v33 = vld [vmem:[%s4732_s0 + $0x24] sm:$0xf]  ;;  %v3695_v34 = vld [vmem:[%s4732_s0 + $0x28] sm:$0xf] }
 0x5e2   : > { %3652 = vmatmul.msk.bf16.vlgmr.msrb.gmra.mxu3 %vm808_vm2, %v1481_v44  ;;  %v3744_v44 = vor.u32 %v4349_v42, %v3743_v41  ;;  %1878 = vmatpush.bf16.msrb.mxu0 %v3736_v39  ;;  %v3689_v38 = vld [vmem:[%s4732_s0 + $0x60] sm:$0xf0]  ;;  %v4327_v39 = vld [vmem:[%s4732_s0 + $0x2c] sm:$0xf]  ;;  %v3688_v41 = vor.u32 %v4334_v37, %v3687_v29  ;;  %v4364_v29 = vld [vmem:[%s4747_s25 + $0x50] sm:$0xff] }
 0x5e3   : > { %1892 = vmatpush.bf16.msra.mxu2 %v3740_v43  ;;  %v3697_v40 = vld [vmem:[%s4732_s0 + $0x68] sm:$0xf0]  ;;  %v3692_v42 = vor.u32 %v4326_v33, %v3689_v38  ;;  %v4380_v37 = vld [vmem:[%s4747_s25 + $0xd0] sm:$0xff]  ;;  %v4354_v38 = vld [vmem:[%s4747_s25] sm:$0xff] }
 0x5e4   : > { %1865 = vmatpush.bf16.msra.mxu3 %v3668_v30  ;;  %1906 = vmatpush.bf16.msra.mxu1 %v3744_v44  ;;  %v3760_v30 = vor.u32 %v4351_v26, %v3759_v23  ;;  %v3700_v44 = vor.u32 %v4327_v39, %v3697_v40  ;;  %v4357_v23 = vld [vmem:[%s4747_s25 + $0x18] sm:$0xff]  ;;  %v4379_v33 = vld [vmem:[%s4747_s25 + $0xc8] sm:$0xff]  ;;  %v4362_v40 = vld [vmem:[%s4747_s25 + $0x40] sm:$0xff] }
 0x5e5   : > { %v4373_v26 = vld [vmem:[%s4747_s25 + $0x98] sm:$0xff] }
 0x5e6   : > { %v4409_v39 = vld [vmem:[%s4747_s25 + $0x1b8] sm:$0xff] }
 0x665   : > { %v1514_v46 = vpop.f32.mrf.mxu3 }
 0x666   : > { %v1515_v47 = vadd.f32 %v4524_v45, %v1514_v46  ;;  %v3745_v46 = vld [vmem:[%s4732_s0 + $0xd8] sm:$0xf0] }
 0x668   : > { %v1519_v48 = vadd.f32 %v1515_v47, %v4786_v14  ;;  %v4950_v14 = vsel %vm1534_vm3, %v4563_v54, %v1533_v58  ;;  %v3671_v47 = vld [vmem:[%s4732_s0 + $0x10] sm:$0xf]  ;;  %v3673_v54 = vld [vmem:[%s4732_s0 + $0x50] sm:$0xf0]  ;;  %v3680_v58 = vor.u32 %v4333_v56, %v3679_v55 }
 0x669   : > { %v4336_v55 = vld [vmem:[%s4732_s0 + $0x6c] sm:$0xf0] }
 0x66a   : > { %v1523_v49 = vsel %vm808_vm2, %v1519_v48, 0.0  ;;  %1907 = vmatpush.bf16.msra.mxu1 %v3680_v58  ;;  %v4328_v58 = vld [vmem:[%s4732_s0 + $0x34] sm:$0xf] }
 0x66b   : > { %1524 = vadd.xlane.f32.xlu0 %v1523_v49 }
 0x66d   : > { %v1516_v36 = vpop.f32.mrf.mxu3 }
 0x66e   : > { %v1517_v50 = vadd.f32 %v4524_v45, %v1516_v36  ;;  %v4341_v45 = vld [vmem:[%s4732_s0 + $0x9c] sm:$0xf] }
 0x66f   : > { %v3748_v36 = vor.u32 %v4341_v45, %v3745_v46  ;;  %v3767_v45 = vld [vmem:[%s4732_s0 + $0xb0] sm:$0xf] }
 0x670   : > { %v1520_v51 = vadd.f32 %v1517_v50, %v4788_v15  ;;  %v4332_v50 = vld [vmem:[%s4732_s0 + $0x4c] sm:$0xf0] }
 0x671   : > { %v3672_v53 = vor.u32 %v4332_v50, %v3671_v47  ;;  %1920 = vmatpush.bf16.msrb.mxu3 %v3748_v36  ;;  %v4352_v46 = vld [vmem:[%s4732_s0 + $0xec] sm:$0xf0]  ;;  %v4344_v47 = vld [vmem:[%s4732_s0 + $0xb4] sm:$0xf]  ;;  %v4353_v36 = vld [vmem:[%s4732_s0 + $0xf4] sm:$0xf0] }
 0x672   : > { %v1526_v52 = vsel %vm808_vm2, %v1520_v51, 0.0  ;;  %v4345_v50 = vld [vmem:[%s4732_s0 + $0xbc] sm:$0xf] }
 0x673   : > { %1527 = vadd.xlane.f32.xlu1 %v1526_v52  ;;  %1879 = vmatpush.bf16.msrb.mxu0 %v3672_v53 }
 0x6de   : > { %v1525_v60 = vpop.xlane.xlu0 %1524 }
 0x6df   : > { %v1536_v59 = vmul.f32 %v4950_v14, %v1525_v60  ;;  %v4325_v60 = vld [vmem:[%s4732_s0 + $0x1c] sm:$0xf] }
 0x6e1   : > { %v4953_v15 = vsub.f32 %v1519_v48, %v1536_v59  ;;  %v3681_v59 = vld [vmem:[%s4732_s0 + $0x58] sm:$0xf0] }
 0x6e3   : > { %v1540_v61 = vmul.f32 %v4953_v15, %v4953_v15 }
 0x6e5   : > { %v1542_v62 = vsel %vm808_vm2, %v1540_v61, 0.0 }
 0x6e6   : > { %v1528_v19 = vpop.xlane.xlu1 %1527  ;;  %1543 = vadd.xlane.f32.xlu2 %v1542_v62  ;;  %v3684_v62 = vor.u32 %v4325_v60, %v3681_v59  ;;  %v3705_v60 = vld [vmem:[%s4732_s0 + $0x70] sm:$0xf0]  ;;  %v3711_v59 = vld [vmem:[%s4732_s0 + $0x38] sm:$0xf] }
 0x6e7   : > { %v1537_v63 = vmul.f32 %v4950_v14, %v1528_v19 }
 0x6e8   : > { %1921 = vmatpush.bf16.msrb.mxu3 %v3684_v62  ;;  %v4329_v62 = vld [vmem:[%s4732_s0 + $0x3c] sm:$0xf] }
 0x6e9   : > { %v4959_v0 = vsub.f32 %v1520_v51, %v1537_v63  ;;  %v4324_v51 = vld [vmem:[%s4732_s0 + $0x14] sm:$0xf] }
 0x6ea   : > { %v3676_v57 = vor.u32 %v4324_v51, %v3673_v54  ;;  %v3777_v51 = vld [vmem:[%s4732_s0 + $0xf8] sm:$0xf0]  ;;  %v3703_v54 = vld [vmem:[%s4732_s0 + $0x30] sm:$0xf] }
 0x6eb   : > { %v1541_v1 = vmul.f32 %v4959_v0, %v4959_v0 }
 0x6ec   : > { %1893 = vmatpush.bf16.msra.mxu2 %v3676_v57  ;;  %v3780_v57 = vor.u32 %v4345_v50, %v3777_v51  ;;  %v4406_v50 = vld [vmem:[%s4747_s25 + $0x1a0] sm:$0xff]  ;;  %v4399_v51 = vld [vmem:[%s4747_s25 + $0x168] sm:$0xff] }
 0x6ed   : > { %v1545_v2 = vsel %vm808_vm2, %v1541_v1, 0.0 }
 0x6ee   : > { %1546 = vadd.xlane.f32.xlu0 %v1545_v2 }
 0x759   : > { %v1544_v5 = vpop.xlane.xlu2 %1543 }
 0x75a   : > { %v1548_v13 = vmul.f32 %v1544_v5, %v4950_v14 }
 0x75c   : > { %v4973_v3 = vadd.f32 1e-05, %v1548_v13 }
 0x75e   : > { %4564 = vrsqrt.f32 %v4973_v3  ;;  %vm1558_vm11 = vweird.f32 %v4973_v3 }
 0x761   : > { %v1547_v31 = vpop.xlane.xlu0 %1546 }
 0x762   : > { %v1549_v35 = vmul.f32 %v1547_v31, %v4950_v14 }
 0x764   : > { %v4565_v48 = vpop.eup %4564  ;;  %v1551_v49 = vadd.f32 1e-05, %v1549_v35  ;;  %v4335_v35 = vld [vmem:[%s4732_s0 + $0x64] sm:$0xf0] }
 0x765   : > { %v1553_v52 = vmul.f32 %v4565_v48, %v4973_v3  ;;  %vm1559_vm10 = vweird.f32 %v4565_v48  ;;  %v4342_v3 = vld [vmem:[%s4732_s0 + $0xa4] sm:$0xf]  ;;  %v3696_v43 = vor.u32 %v4335_v35, %v3695_v34  ;;  %v4393_v35 = vld [vmem:[%s4747_s25 + $0x138] sm:$0xff] }
 0x766   : > { %4566 = vrsqrt.f32 %v1551_v49  ;;  %vm1560_vm12 = vmor %vm1558_vm11, %vm1559_vm10  ;;  %vm1568_vm14 = vweird.f32 %v1551_v49  ;;  %v3756_v28 = vor.u32 %v4342_v3, %v3753_v22  ;;  %v4366_v3 = vld [vmem:[%s4747_s25 + $0x60] sm:$0xff] }
 0x767   : > { %v1554_v61 = vmul.f32 %v4565_v48, %v1553_v52  ;;  %v3768_v52 = vor.u32 %v4352_v46, %v3767_v45  ;;  %v4382_v22 = vld [vmem:[%s4747_s25 + $0xe0] sm:$0xff]  ;;  %v4408_v45 = vld [vmem:[%s4747_s25 + $0x1b0] sm:$0xff] }
 0x768   : > { %v4370_v34 = vld [vmem:[%s4747_s25 + $0x80] sm:$0xff]  ;;  %v4400_v46 = vld [vmem:[%s4747_s25 + $0x170] sm:$0xff] }
 0x769   : > { %v1555_v19 = vmul.f32 0.5, %v1554_v61  ;;  %v4337_v61 = vld [vmem:[%s4732_s0 + $0x74] sm:$0xf0] }
 0x76b   : > { %v1556_v63 = vsub.f32 1.5, %v1555_v19  ;;  %v3713_v19 = vld [vmem:[%s4732_s0 + $0x78] sm:$0xf0] }
 0x76c   : > { %v4567_v1 = vpop.eup %4566 }
 0x76d   : > { %v1557_v2 = vmul.f32 %v4565_v48, %v1556_v63  ;;  %v1563_v4 = vmul.f32 %v4567_v1, %v1551_v49  ;;  %vm1569_vm13 = vweird.f32 %v4567_v1  ;;  %v3775_v49 = vld [vmem:[%s4732_s0 + $0xb8] sm:$0xf]  ;;  %v3704_v63 = vor.u32 %v4336_v55, %v3703_v54  ;;  %v4398_v55 = vld [vmem:[%s4747_s25 + $0x160] sm:$0xff] }
 0x76e   : > { %vm1570_vm15 = vmor %vm1568_vm14, %vm1569_vm13  ;;  %v3776_v56 = vor.u32 %v4353_v36, %v3775_v49  ;;  %v4407_v49 = vld [vmem:[%s4747_s25 + $0x1a8] sm:$0xff]  ;;  %v4390_v36 = vld [vmem:[%s4747_s25 + $0x120] sm:$0xff] }
 0x76f   : > { %v1564_v6 = vmul.f32 %v4567_v1, %v1563_v4  ;;  %v1561_v7 = vsel %vm1560_vm12, %v4565_v48, %v1557_v2  ;;  %v3769_v48 = vld [vmem:[%s4732_s0 + $0xf0] sm:$0xf0]  ;;  %v3712_v2 = vor.u32 %v4337_v61, %v3711_v59  ;;  %v3716_v4 = vor.u32 %v4329_v62, %v3713_v19  ;;  %v4405_v54 = vld [vmem:[%s4747_s25 + $0x198] sm:$0xff]  ;;  %v4387_v61 = vld [vmem:[%s4747_s25 + $0x108] sm:$0xff] }
 0x770   : > { %v1572_v11 = vmul.f32 %v1561_v7, %v4953_v15  ;;  %v4350_v15 = vld [vmem:[%s4732_s0 + $0xdc] sm:$0xf0]  ;;  %v3772_v53 = vor.u32 %v4344_v47, %v3769_v48  ;;  %v4377_v7 = vld [vmem:[%s4747_s25 + $0xb8] sm:$0xff]  ;;  %v4416_v47 = vld [vmem:[%s4747_s25 + $0x1f0] sm:$0xff] }
 0x771   : > { %v1565_v5 = vmul.f32 0.5, %v1564_v6  ;;  %v3752_v27 = vor.u32 %v4350_v15, %v3751_v21  ;;  %v4361_v6 = vld [vmem:[%s4747_s25 + $0x38] sm:$0xff]  ;;  %v4358_v21 = vld [vmem:[%s4747_s25 + $0x20] sm:$0xff]  ;;  %v4391_v48 = vld [vmem:[%s4747_s25 + $0x128] sm:$0xff] }
 0x772   : > { %v1577_v17 = vmul.f32 %v4525_v10, %v1572_v11  ;;  %v4376_v11 = vld [vmem:[%s4747_s25 + $0xb0] sm:$0xff]  ;;  %v4374_v15 = vld [vmem:[%s4747_s25 + $0xa0] sm:$0xff]  ;;  %v4413_v59 = vld [vmem:[%s4747_s25 + $0x1d8] sm:$0xff] }
 0x773   : > { %v1566_v9 = vsub.f32 1.5, %v1565_v5  ;;  %v4369_v5 = vld [vmem:[%s4747_s25 + $0x78] sm:$0xff]  ;;  %v4403_v62 = vld [vmem:[%s4747_s25 + $0x188] sm:$0xff]  ;;  %v4396_v19 = vld [vmem:[%s4747_s25 + $0x150] sm:$0xff] }
 0x774   : > { %v5020_v24 = vadd.f32 %v4526_v16, %v1577_v17  ;;  %v4375_v17 = vld [vmem:[%s4747_s25 + $0xa8] sm:$0xff] }
 0x775   : > { %v1567_v12 = vmul.f32 %v4567_v1, %v1566_v9  ;;  %v4385_v9 = vld [vmem:[%s4747_s25 + $0xf8] sm:$0xff] }
 0x777   : > { %v1571_v13 = vsel %vm1570_vm15, %v4567_v1, %v1567_v12  ;;  %v3708_v1 = vor.u32 %v4328_v58, %v3705_v60  ;;  %v4368_v12 = vld [vmem:[%s4747_s25 + $0x70] sm:$0xff]  ;;  %v4397_v60 = vld [vmem:[%s4747_s25 + $0x158] sm:$0xff] }
 0x778   : > { %v1573_v18 = vmul.f32 %v1571_v13, %v4959_v0  ;;  %v3761_v0 = vld [vmem:[%s4732_s0 + $0xe8] sm:$0xf0]  ;;  %v4384_v13 = vld [vmem:[%s4747_s25 + $0xf0] sm:$0xff]  ;;  %s5335_s0 = sld [smem:[#allocation14_spill]] (!%p4309_p5) }
 0x779   : > { %v3764_v31 = vor.u32 %v4343_v8, %v3761_v0  ;;  %v4365_v8 = vld [vmem:[%s4747_s25 + $0x58] sm:$0xff]  ;;  %v4404_v58 = vld [vmem:[%s4747_s25 + $0x190] sm:$0xff] }
 0x77a   : > { %v1578_v20 = vmul.f32 %v4525_v10, %v1573_v18  ;;  %v4360_v10 = vld [vmem:[%s4747_s25 + $0x30] sm:$0xff]  ;;  %v4367_v18 = vld [vmem:[%s4747_s25 + $0x68] sm:$0xff]  ;;  %v4381_v0 = vld [vmem:[%s4747_s25 + $0xd8] sm:$0xff] }
 0x77c   : > { %v5022_v25 = vadd.f32 %v4526_v16, %v1578_v20  ;;  %v4359_v16 = vld [vmem:[%s4747_s25 + $0x28] sm:$0xff] }
 0x77d   : > { %v4383_v20 = vld [vmem:[%s4747_s25 + $0xe8] sm:$0xff] }
 0x77e   : > { %v5029_v32 = vpack.c.bf16 %v5022_v25, %v5020_v24 }
 0x780   : > { %3781 = vmatmul.msk.bf16.vlgmr.msra.gmra.mxu0 %vm808_vm2, %v5029_v32  ;;  %3782 = vmatmul.msk.bf16.vlgmr.msrb.gmra.mxu2 %vm808_vm2, %v5029_v32 }
 0x781   : > { %3783 = vmatmul.msk.bf16.vlgmr.msrb.gmra.mxu1 %vm808_vm2, %v5029_v32  ;;  %3784 = vmatmul.msk.bf16.vlgmr.msra.gmra.mxu3 %vm808_vm2, %v5029_v32 }
 0x782   : > { %1934 = vmatpush.bf16.msra.mxu0 %v3752_v27  ;;  %1948 = vmatpush.bf16.msrb.mxu2 %v3756_v28  ;;  %v4356_v27 = vld [vmem:[%s4747_s25 + $0x10] sm:$0xff] }
 0x783   : > { %1962 = vmatpush.bf16.msrb.mxu1 %v3760_v30  ;;  %1976 = vmatpush.bf16.msra.mxu3 %v3764_v31  ;;  %v4372_v28 = vld [vmem:[%s4747_s25 + $0x90] sm:$0xff]  ;;  %v4355_v30 = vld [vmem:[%s4747_s25 + $0x8] sm:$0xff] }
 0x784   : > { %v4363_v31 = vld [vmem:[%s4747_s25 + $0x48] sm:$0xff] }
 0x786   : > { %1935 = vmatpush.bf16.msra.mxu0 %v3688_v41  ;;  %1949 = vmatpush.bf16.msrb.mxu2 %v3692_v42  ;;  %v4378_v41 = vld [vmem:[%s4747_s25 + $0xc0] sm:$0xff]  ;;  %v4401_v42 = vld [vmem:[%s4747_s25 + $0x178] sm:$0xff] }
 0x787   : > { %1963 = vmatpush.bf16.msrb.mxu1 %v3696_v43  ;;  %1977 = vmatpush.bf16.msra.mxu3 %v3700_v44  ;;  %v4417_v43 = vld [vmem:[%s4747_s25 + $0x1f8] sm:$0xff]  ;;  %v4392_v44 = vld [vmem:[%s4747_s25 + $0x130] sm:$0xff] }
 0x790   : > { %3785 = vmatmul.msk.bf16.vlgmr.msrb.gmra.mxu0 %vm808_vm2, %v5029_v32  ;;  %3786 = vmatmul.msk.bf16.vlgmr.msra.gmra.mxu2 %vm808_vm2, %v5029_v32 }
 0x791   : > { %3787 = vmatmul.msk.bf16.vlgmr.msra.gmra.mxu1 %vm808_vm2, %v5029_v32  ;;  %3788 = vmatmul.msk.bf16.vlgmr.msrb.gmra.mxu3 %vm808_vm2, %v5029_v32 }
 0x792   : > { %1990 = vmatpush.bf16.msrb.mxu0 %v3768_v52  ;;  %2004 = vmatpush.bf16.msra.mxu2 %v3772_v53  ;;  %v4415_v52 = vld [vmem:[%s4747_s25 + $0x1e8] sm:$0xff]  ;;  %v4389_v53 = vld [vmem:[%s4747_s25 + $0x118] sm:$0xff] }
 0x793   : > { %2018 = vmatpush.bf16.msra.mxu1 %v3776_v56  ;;  %2032 = vmatpush.bf16.msrb.mxu3 %v3780_v57  ;;  %v4414_v56 = vld [vmem:[%s4747_s25 + $0x1e0] sm:$0xff]  ;;  %v4388_v57 = vld [vmem:[%s4747_s25 + $0x110] sm:$0xff] }
 0x796   : > { %1991 = vmatpush.bf16.msrb.mxu0 %v3704_v63  ;;  %2005 = vmatpush.bf16.msra.mxu2 %v3708_v1  ;;  %v4412_v63 = vld [vmem:[%s4747_s25 + $0x1d0] sm:$0xff]  ;;  %v4386_v1 = vld [vmem:[%s4747_s25 + $0x100] sm:$0xff] }
 0x797   : > { %2019 = vmatpush.bf16.msra.mxu1 %v3712_v2  ;;  %2033 = vmatpush.bf16.msrb.mxu3 %v3716_v4  ;;  %v4402_v2 = vld [vmem:[%s4747_s25 + $0x180] sm:$0xff]  ;;  %v4395_v4 = vld [vmem:[%s4747_s25 + $0x148] sm:$0xff] }
 0x7a0   : > { %3789 = vmatmul.msk.bf16.vlgmr.msra.gmra.mxu0 %vm808_vm2, %v5029_v32  ;;  %3790 = vmatmul.msk.bf16.vlgmr.msrb.gmra.mxu2 %vm808_vm2, %v5029_v32 }
 0x7a1   : > { %3791 = vmatmul.msk.bf16.vlgmr.msrb.gmra.mxu1 %vm808_vm2, %v5029_v32  ;;  %3792 = vmatmul.msk.bf16.vlgmr.msra.gmra.mxu3 %vm808_vm2, %v5029_v32 }
 0x7a2   : > { %3116 = vmatpush.bf16.msra.mxu0 %v4361_v6  ;;  %3144 = vmatpush.bf16.msrb.mxu1 %v4377_v7  ;;  %v4411_v6 = vld [vmem:[%s4747_s25 + $0x1c8] sm:$0xff]  ;;  %v4394_v7 = vld [vmem:[%s4747_s25 + $0x140] sm:$0xff] }
 0x7a3   : > { %3130 = vmatpush.bf16.msrb.mxu2 %v4369_v5  ;;  %3158 = vmatpush.bf16.msra.mxu3 %v4385_v9  ;;  %v4410_v5 = vld [vmem:[%s4747_s25 + $0x1c0] sm:$0xff] }
 0x7a4   : > { %v5152_v9 = vld [vmem:[%s4737_s20] sm:$0xff] }
 0x7a6   : > { %3117 = vmatpush.bf16.msra.mxu0 %v4360_v10  ;;  %3145 = vmatpush.bf16.msrb.mxu1 %v4376_v11 }
 0x7a7   : > { %3131 = vmatpush.bf16.msrb.mxu2 %v4368_v12  ;;  %3159 = vmatpush.bf16.msra.mxu3 %v4384_v13  ;;  %v1621_v12 = vperm.slane %v5152_v9, 0  ;;  %v1623_v13 = vperm.slane %v5152_v9, 2 }
 0x7aa   : > { %3118 = vmatpush.bf16.msra.mxu0 %v4359_v16  ;;  %3146 = vmatpush.bf16.msrb.mxu1 %v4375_v17 }
 0x7ab   : > { %3132 = vmatpush.bf16.msrb.mxu2 %v4367_v18  ;;  %3160 = vmatpush.bf16.msra.mxu3 %v4383_v20 }
 0x7ae   : > { %3119 = vmatpush.bf16.msra.mxu0 %v4358_v21  ;;  %3147 = vmatpush.bf16.msrb.mxu1 %v4374_v15  ;;  %v1622_v15 = vperm.slane %v5152_v9, 1 }
 0x7af   : > { %3133 = vmatpush.bf16.msrb.mxu2 %v4366_v3  ;;  %3161 = vmatpush.bf16.msra.mxu3 %v4382_v22 }
 0x7b0   : > { %3793 = vmatmul.msk.bf16.vlgmr.msrb.gmra.mxu0 %vm808_vm2, %v5029_v32  ;;  %3794 = vmatmul.msk.bf16.vlgmr.msra.gmra.mxu2 %vm808_vm2, %v5029_v32 }
 0x7b1   : > { %3795 = vmatmul.msk.bf16.vlgmr.msra.gmra.mxu1 %vm808_vm2, %v5029_v32  ;;  %3796 = vmatmul.msk.bf16.vlgmr.msrb.gmra.mxu3 %vm808_vm2, %v5029_v32  ;;  %v4371_v32 = vld [vmem:[%s4747_s25 + $0x88] sm:$0xff] }
 0x7b2   : > { %3120 = vmatpush.bf16.msra.mxu0 %v4357_v23  ;;  %3148 = vmatpush.bf16.msrb.mxu1 %v4373_v26  ;;  %v1624_v23 = vperm.slane %v5152_v9, 3 }
 0x7b3   : > { %3134 = vmatpush.bf16.msrb.mxu2 %v4365_v8  ;;  %3162 = vmatpush.bf16.msra.mxu3 %v4381_v0 }
 0x7b6   : > { %3121 = vmatpush.bf16.msra.mxu0 %v4356_v27  ;;  %3149 = vmatpush.bf16.msrb.mxu1 %v4372_v28 }
 0x7b7   : > { %3135 = vmatpush.bf16.msrb.mxu2 %v4364_v29  ;;  %3163 = vmatpush.bf16.msra.mxu3 %v4380_v37  ;;  %v4425_v29 = vld [vmem:[%s4747_s25 + $0x238] sm:$0xff] }
 0x7ba   : > { %3122 = vmatpush.bf16.msra.mxu0 %v4355_v30  ;;  %3150 = vmatpush.bf16.msrb.mxu1 %v4371_v32  ;;  %v4441_v32 = vld [vmem:[%s4747_s25 + $0x2b8] sm:$0xff] }
 0x7bb   : > { %3136 = vmatpush.bf16.msrb.mxu2 %v4363_v31  ;;  %3164 = vmatpush.bf16.msra.mxu3 %v4379_v33 }
 0x7be   : > { %3123 = vmatpush.bf16.msra.mxu0 %v4354_v38  ;;  %3151 = vmatpush.bf16.msrb.mxu1 %v4370_v34 }
 0x7bf   : > { %3137 = vmatpush.bf16.msrb.mxu2 %v4362_v40  ;;  %3165 = vmatpush.bf16.msra.mxu3 %v4378_v41  ;;  %v4424_v41 = vld [vmem:[%s4747_s25 + $0x230] sm:$0xff] }
 0x7c2   : > { %3172 = vmatpush.bf16.msrb.mxu0 %v4393_v35  ;;  %3200 = vmatpush.bf16.msra.mxu1 %v4409_v39 }
 0x7c3   : > { %3186 = vmatpush.bf16.msra.mxu2 %v4401_v42  ;;  %3214 = vmatpush.bf16.msrb.mxu3 %v4417_v43 }
 0x7c6   : > { %3173 = vmatpush.bf16.msrb.mxu0 %v4392_v44  ;;  %3201 = vmatpush.bf16.msra.mxu1 %v4408_v45  ;;  %v4440_v45 = vld [vmem:[%s4747_s25 + $0x2b0] sm:$0xff] }
 0x7c7   : > { %3187 = vmatpush.bf16.msra.mxu2 %v4400_v46  ;;  %3215 = vmatpush.bf16.msrb.mxu3 %v4416_v47 }
 0x7ca   : > { %3174 = vmatpush.bf16.msrb.mxu0 %v4391_v48  ;;  %3202 = vmatpush.bf16.msra.mxu1 %v4407_v49  ;;  %v4433_v48 = vld [vmem:[%s4747_s25 + $0x278] sm:$0xff] }
 0x7cb   : > { %3188 = vmatpush.bf16.msra.mxu2 %v4399_v51  ;;  %3216 = vmatpush.bf16.msrb.mxu3 %v4415_v52  ;;  %v1627_v52 = vperm.slane %v5152_v9, 6 }
 0x7ce   : > { %3175 = vmatpush.bf16.msrb.mxu0 %v4390_v36  ;;  %3203 = vmatpush.bf16.msra.mxu1 %v4406_v50  ;;  %v1625_v36 = vperm.slane %v5152_v9, 4  ;;  %v4449_v50 = vld [vmem:[%s4747_s25 + $0x2f8] sm:$0xff] }
 0x7cf   : > { %3189 = vmatpush.bf16.msra.mxu2 %v4398_v55  ;;  %3217 = vmatpush.bf16.msrb.mxu3 %v4414_v56  ;;  %v4432_v56 = vld [vmem:[%s4747_s25 + $0x270] sm:$0xff] }
 0x7d2   : > { %3176 = vmatpush.bf16.msrb.mxu0 %v4389_v53  ;;  %3204 = vmatpush.bf16.msra.mxu1 %v4405_v54  ;;  %v4423_v53 = vld [vmem:[%s4747_s25 + $0x228] sm:$0xff] }
 0x7d3   : > { %3190 = vmatpush.bf16.msra.mxu2 %v4397_v60  ;;  %3218 = vmatpush.bf16.msrb.mxu3 %v4413_v59  ;;  %v4439_v54 = vld [vmem:[%s4747_s25 + $0x2a8] sm:$0xff]  ;;  %v4448_v60 = vld [vmem:[%s4747_s25 + $0x2f0] sm:$0xff] }
 0x7d6   : > { %3177 = vmatpush.bf16.msrb.mxu0 %v4388_v57  ;;  %3205 = vmatpush.bf16.msra.mxu1 %v4404_v58 }
 0x7d7   : > { %3191 = vmatpush.bf16.msra.mxu2 %v4396_v19  ;;  %3219 = vmatpush.bf16.msrb.mxu3 %v4412_v63  ;;  %v1626_v19 = vperm.slane %v5152_v9, 5 }
 0x7da   : > { %3178 = vmatpush.bf16.msrb.mxu0 %v4387_v61  ;;  %3206 = vmatpush.bf16.msra.mxu1 %v4403_v62  ;;  %v4422_v62 = vld [vmem:[%s4747_s25 + $0x220] sm:$0xff] }
 0x7db   : > { %3192 = vmatpush.bf16.msra.mxu2 %v4395_v4  ;;  %3220 = vmatpush.bf16.msrb.mxu3 %v4411_v6  ;;  %v1628_v4 = vperm.slane %v5152_v9, 7 }
 0x7de   : > { %3179 = vmatpush.bf16.msrb.mxu0 %v4386_v1  ;;  %3207 = vmatpush.bf16.msra.mxu1 %v4402_v2  ;;  %v4438_v2 = vld [vmem:[%s4747_s25 + $0x2a0] sm:$0xff] }
 0x7df   : > { %3193 = vmatpush.bf16.msra.mxu2 %v4394_v7  ;;  %3221 = vmatpush.bf16.msrb.mxu3 %v4410_v5  ;;  %v4431_v7 = vld [vmem:[%s4747_s25 + $0x268] sm:$0xff] }
 0x7fd   : > { %v1825_v10 = vpop.f32.mrf.mxu0 }
 0x7fe   : > { %v1853_v11 = vpop.f32.mrf.mxu1  ;;  %v1826_v17 = vadd.f32 %v1825_v10, %v1621_v12 }
 0x7ff   : > { %v1854_v20 = vadd.f32 %v1853_v11, %v1623_v13  ;;  %v4447_v11 = vld [vmem:[%s4747_s25 + $0x2e8] sm:$0xff] }
 0x800   : > { %v2040_v8 = vmax.f32 %v1826_v17, 0.0 }
 0x801   : > { %v2042_v27 = vmax.f32 %v1854_v20, 0.0  ;;  %v4437_v20 = vld [vmem:[%s4747_s25 + $0x298] sm:$0xff] }
 0x803   : > { %v1839_v16 = vpop.f32.mrf.mxu2 }
 0x804   : > { %v1867_v18 = vpop.f32.mrf.mxu3  ;;  %v1840_v37 = vadd.f32 %v1839_v16, %v1622_v15  ;;  %v4421_v16 = vld [vmem:[%s4747_s25 + $0x218] sm:$0xff] }
 0x805   : > { %v1827_v21 = vpop.f32.mrf.mxu0  ;;  %v1868_v31 = vadd.f32 %v1867_v18, %v1624_v23 }
 0x806   : > { %v1828_v3 = vadd.f32 %v1827_v21, %v1621_v12  ;;  %v1855_v22 = vpop.f32.mrf.mxu1  ;;  %v2041_v42 = vmax.f32 %v1840_v37, 0.0 }
 0x807   : > { %v1856_v26 = vadd.f32 %v1855_v22, %v1623_v13  ;;  %v2043_v46 = vmax.f32 %v1868_v31, 0.0 }
 0x808   : > { %v2056_v0 = vmax.f32 %v1828_v3, 0.0  ;;  %v4430_v3 = vld [vmem:[%s4747_s25 + $0x260] sm:$0xff] }
 0x809   : > { %v2058_v28 = vmax.f32 %v1856_v26, 0.0  ;;  %v4446_v26 = vld [vmem:[%s4747_s25 + $0x2e0] sm:$0xff] }
 0x80a   : > { %v2072_v30 = vpack.c.bf16 %v2056_v0, %v2040_v8  ;;  %v5181_v0 = vld [vmem:[%s4737_s20 + $0x8] sm:$0xff] }
 0x80b   : > { %v2074_v33 = vpack.c.bf16 %v2058_v28, %v2042_v27  ;;  %v1841_v38 = vpop.f32.mrf.mxu2  ;;  %v4420_v28 = vld [vmem:[%s4747_s25 + $0x210] sm:$0xff] }
 0x80c   : > { %v1842_v34 = vadd.f32 %v1841_v38, %v1622_v15  ;;  %v1869_v35 = vpop.f32.mrf.mxu3  ;;  %3124 = vmatmul.bf16.vlgmr.msra.gmra.mxu0 %v2072_v30  ;;  %v4429_v38 = vld [vmem:[%s4747_s25 + $0x258] sm:$0xff] }
 0x80d   : > { %v1870_v39 = vadd.f32 %v1869_v35, %v1624_v23  ;;  %3152 = vmatmul.bf16.vlgmr.msrb.gmra.mxu1 %v2074_v33  ;;  %3228 = vmatpush.bf16.msra.mxu0 %v4425_v29  ;;  %v1881_v40 = vpop.f32.mrf.mxu0  ;;  %v1629_v35 = vperm.slane %v5181_v0, 0 }
 0x80e   : > { %v2057_v43 = vmax.f32 %v1842_v34, 0.0  ;;  %3256 = vmatpush.bf16.msrb.mxu1 %v4441_v32  ;;  %v1909_v44 = vpop.f32.mrf.mxu1  ;;  %v1882_v57 = vadd.f32 %v1881_v40, %v1625_v36  ;;  %v4436_v32 = vld [vmem:[%s4747_s25 + $0x290] sm:$0xff] }
 0x80f   : > { %v2059_v47 = vmax.f32 %v1870_v39, 0.0  ;;  %v1910_v59 = vadd.f32 %v1909_v44, %v1627_v52  ;;  %v4445_v39 = vld [vmem:[%s4747_s25 + $0x2d8] sm:$0xff] }
 0x810   : > { %v2073_v49 = vpack.c.bf16 %v2057_v43, %v2041_v42  ;;  %v2044_v5 = vmax.f32 %v1882_v57, 0.0  ;;  %v4419_v42 = vld [vmem:[%s4747_s25 + $0x208] sm:$0xff] }
 0x811   : > { %v2075_v51 = vpack.c.bf16 %v2059_v47, %v2043_v46  ;;  %3229 = vmatpush.bf16.msra.mxu0 %v4424_v41  ;;  %v2046_v12 = vmax.f32 %v1910_v59, 0.0  ;;  %v1631_v41 = vperm.slane %v5181_v0, 2  ;;  %v4435_v43 = vld [vmem:[%s4747_s25 + $0x288] sm:$0xff] }
 0x812   : > { %3257 = vmatpush.bf16.msrb.mxu1 %v4440_v45  ;;  %3138 = vmatmul.bf16.vlgmr.msrb.gmra.mxu2 %v2073_v49  ;;  %v4428_v45 = vld [vmem:[%s4747_s25 + $0x250] sm:$0xff] }
 0x813   : > { %3166 = vmatmul.bf16.vlgmr.msra.gmra.mxu3 %v2075_v51  ;;  %3242 = vmatpush.bf16.msrb.mxu2 %v4433_v48  ;;  %v1895_v55 = vpop.f32.mrf.mxu2  ;;  %v4444_v48 = vld [vmem:[%s4747_s25 + $0x2d0] sm:$0xff]  ;;  %v1630_v51 = vperm.slane %v5181_v0, 1 }
 0x814   : > { %3270 = vmatpush.bf16.msra.mxu3 %v4449_v50  ;;  %v1923_v58 = vpop.f32.mrf.mxu3  ;;  %v1896_v17 = vadd.f32 %v1895_v55, %v1626_v19  ;;  %v4418_v50 = vld [vmem:[%s4747_s25 + $0x200] sm:$0xff]  ;;  %v4457_v55 = vld [vmem:[%s4747_s25 + $0x338] sm:$0xff] }
 0x815   : > { %3230 = vmatpush.bf16.msra.mxu0 %v4423_v53  ;;  %v1883_v61 = vpop.f32.mrf.mxu0  ;;  %v1924_v9 = vadd.f32 %v1923_v58, %v1628_v4  ;;  %v4473_v58 = vld [vmem:[%s4747_s25 + $0x3b8] sm:$0xff] }
 0x816   : > { %3258 = vmatpush.bf16.msrb.mxu1 %v4439_v54  ;;  %v1884_v63 = vadd.f32 %v1883_v61, %v1625_v36  ;;  %v1911_v1 = vpop.f32.mrf.mxu1  ;;  %v2045_v29 = vmax.f32 %v1896_v17, 0.0  ;;  %v4434_v54 = vld [vmem:[%s4747_s25 + $0x280] sm:$0xff]  ;;  %v4465_v17 = vld [vmem:[%s4747_s25 + $0x378] sm:$0xff] }
 0x817   : > { %v1912_v6 = vadd.f32 %v1911_v1, %v1627_v52  ;;  %3243 = vmatpush.bf16.msrb.mxu2 %v4432_v56  ;;  %v2047_v31 = vmax.f32 %v1924_v9, 0.0  ;;  %v1632_v56 = vperm.slane %v5181_v0, 3 }
 0x818   : > { %v2060_v10 = vmax.f32 %v1884_v63, 0.0  ;;  %3271 = vmatpush.bf16.msra.mxu3 %v4448_v60  ;;  %v4427_v60 = vld [vmem:[%s4747_s25 + $0x248] sm:$0xff] }
 0x819   : > { %v2062_v13 = vmax.f32 %v1912_v6, 0.0  ;;  %3231 = vmatpush.bf16.msra.mxu0 %v4422_v62  ;;  %v4443_v62 = vld [vmem:[%s4747_s25 + $0x2c8] sm:$0xff] }
 0x81a   : > { %v2076_v18 = vpack.c.bf16 %v2060_v10, %v2044_v5  ;;  %3259 = vmatpush.bf16.msrb.mxu1 %v4438_v2  ;;  %v4472_v10 = vld [vmem:[%s4747_s25 + $0x3b0] sm:$0xff] }
 0x81b   : > { %v2078_v21 = vpack.c.bf16 %v2062_v13, %v2046_v12  ;;  %3244 = vmatpush.bf16.msrb.mxu2 %v4431_v7  ;;  %v1897_v15 = vpop.f32.mrf.mxu2 }
 0x81c   : > { %3272 = vmatpush.bf16.msra.mxu3 %v4447_v11  ;;  %v1898_v22 = vadd.f32 %v1897_v15, %v1626_v19  ;;  %v1925_v23 = vpop.f32.mrf.mxu3  ;;  %3180 = vmatmul.bf16.vlgmr.msrb.gmra.mxu0 %v2076_v18  ;;  %v4426_v11 = vld [vmem:[%s4747_s25 + $0x240] sm:$0xff]  ;;  %v4455_v15 = vld [vmem:[%s4747_s25 + $0x328] sm:$0xff] }
 0x81d   : > { %v1926_v8 = vadd.f32 %v1925_v23, %v1628_v4  ;;  %3208 = vmatmul.bf16.vlgmr.msra.gmra.mxu1 %v2078_v21  ;;  %3232 = vmatpush.bf16.msra.mxu0 %v4421_v16  ;;  %v1937_v27 = vpop.f32.mrf.mxu0  ;;  %v4456_v4 = vld [vmem:[%s4747_s25 + $0x330] sm:$0xff]  ;;  %v4442_v16 = vld [vmem:[%s4747_s25 + $0x2c0] sm:$0xff]  ;;  %v4471_v23 = vld [vmem:[%s4747_s25 + $0x3a8] sm:$0xff] }
 0x81e   : > { %v2061_v37 = vmax.f32 %v1898_v22, 0.0  ;;  %3260 = vmatpush.bf16.msrb.mxu1 %v4437_v20  ;;  %v1965_v30 = vpop.f32.mrf.mxu1  ;;  %v1938_v46 = vadd.f32 %v1937_v27, %v1629_v35  ;;  %v4481_v20 = vld [vmem:[%s4747_s25 + $0x3f8] sm:$0xff] }
 0x81f   : > { %v2063_v33 = vmax.f32 %v1926_v8, 0.0  ;;  %3245 = vmatpush.bf16.msrb.mxu2 %v4430_v3  ;;  %v1966_v49 = vadd.f32 %v1965_v30, %v1631_v41  ;;  %v4464_v8 = vld [vmem:[%s4747_s25 + $0x370] sm:$0xff] }
 0x820   : > { %v2077_v34 = vpack.c.bf16 %v2061_v37, %v2045_v29  ;;  %3273 = vmatpush.bf16.msra.mxu3 %v4446_v26  ;;  %v2048_v59 = vmax.f32 %v1938_v46, 0.0  ;;  %v4454_v37 = vld [vmem:[%s4747_s25 + $0x320] sm:$0xff]  ;;  %v1633_v46 = vperm.slane %v5181_v0, 4 }
 0x821   : > { %v2079_v40 = vpack.c.bf16 %v2063_v33, %v2047_v31  ;;  %3233 = vmatpush.bf16.msra.mxu0 %v4420_v28  ;;  %v2050_v19 = vmax.f32 %v1966_v49, 0.0  ;;  %v4480_v28 = vld [vmem:[%s4747_s25 + $0x3f0] sm:$0xff]  ;;  %v4463_v31 = vld [vmem:[%s4747_s25 + $0x368] sm:$0xff]  ;;  %v1635_v49 = vperm.slane %v5181_v0, 6 }
 0x822   : > { %3261 = vmatpush.bf16.msrb.mxu1 %v4436_v32  ;;  %3194 = vmatmul.bf16.vlgmr.msra.gmra.mxu2 %v2077_v34  ;;  %v4470_v32 = vld [vmem:[%s4747_s25 + $0x3a0] sm:$0xff]  ;;  %v4479_v33 = vld [vmem:[%s4747_s25 + $0x3e8] sm:$0xff]  ;;  %v4469_v34 = vld [vmem:[%s4747_s25 + $0x398] sm:$0xff] }
 0x823   : > { %3222 = vmatmul.bf16.vlgmr.msrb.gmra.mxu3 %v2079_v40  ;;  %3246 = vmatpush.bf16.msrb.mxu2 %v4429_v38  ;;  %v1951_v44 = vpop.f32.mrf.mxu2  ;;  %v4453_v38 = vld [vmem:[%s4747_s25 + $0x318] sm:$0xff] }
 0x824   : > { %3274 = vmatpush.bf16.msra.mxu3 %v4445_v39  ;;  %v1979_v47 = vpop.f32.mrf.mxu3  ;;  %v1952_v1 = vadd.f32 %v1951_v44, %v1630_v51  ;;  %v4462_v39 = vld [vmem:[%s4747_s25 + $0x360] sm:$0xff] }
 0x825   : > { %3234 = vmatpush.bf16.msra.mxu0 %v4419_v42  ;;  %v1939_v36 = vpop.f32.mrf.mxu0  ;;  %v1980_v6 = vadd.f32 %v1979_v47, %v1632_v56  ;;  %v4452_v42 = vld [vmem:[%s4747_s25 + $0x310] sm:$0xff] }
 0x826   : > { %3262 = vmatpush.bf16.msrb.mxu1 %v4435_v43  ;;  %v1940_v52 = vadd.f32 %v1939_v36, %v1629_v35  ;;  %v1967_v53 = vpop.f32.mrf.mxu1  ;;  %v2049_v9 = vmax.f32 %v1952_v1, 0.0  ;;  %v4468_v43 = vld [vmem:[%s4747_s25 + $0x390] sm:$0xff]  ;;  %v4451_v36 = vld [vmem:[%s4747_s25 + $0x308] sm:$0xff] }
 0x827   : > { %v1968_v57 = vadd.f32 %v1967_v53, %v1631_v41  ;;  %3247 = vmatpush.bf16.msrb.mxu2 %v4428_v45  ;;  %v2051_v3 = vmax.f32 %v1980_v6, 0.0  ;;  %v4478_v41 = vld [vmem:[%s4747_s25 + $0x3e0] sm:$0xff]  ;;  %v4461_v45 = vld [vmem:[%s4747_s25 + $0x358] sm:$0xff]  ;;  %v4460_v53 = vld [vmem:[%s4747_s25 + $0x350] sm:$0xff] }
 0x828   : > { %v2064_v61 = vmax.f32 %v1940_v52, 0.0  ;;  %3275 = vmatpush.bf16.msra.mxu3 %v4444_v48  ;;  %v4477_v48 = vld [vmem:[%s4747_s25 + $0x3d8] sm:$0xff]  ;;  %v4459_v1 = vld [vmem:[%s4747_s25 + $0x348] sm:$0xff] }
 0x829   : > { %v2066_v63 = vmax.f32 %v1968_v57, 0.0  ;;  %3235 = vmatpush.bf16.msra.mxu0 %v4418_v50  ;;  %v4475_v6 = vld [vmem:[%s4747_s25 + $0x3c8] sm:$0xff] }
 0x82a   : > { %v2080_v2 = vpack.c.bf16 %v2064_v61, %v2048_v59  ;;  %3263 = vmatpush.bf16.msrb.mxu1 %v4434_v54 }
 0x82b   : > { %v2082_v7 = vpack.c.bf16 %v2066_v63, %v2050_v19  ;;  %3248 = vmatpush.bf16.msrb.mxu2 %v4427_v60  ;;  %v1953_v5 = vpop.f32.mrf.mxu2  ;;  %v1634_v60 = vperm.slane %v5181_v0, 5  ;;  %v1636_v19 = vperm.slane %v5181_v0, 7 }
 0x82c   : > { %3276 = vmatpush.bf16.msra.mxu3 %v4443_v62  ;;  %v1954_v12 = vadd.f32 %v1953_v5, %v1630_v51  ;;  %v1981_v13 = vpop.f32.mrf.mxu3  ;;  %3236 = vmatmul.bf16.vlgmr.msra.gmra.mxu0 %v2080_v2  ;;  %v4467_v51 = vld [vmem:[%s4747_s25 + $0x388] sm:$0xff]  ;;  %v4466_v62 = vld [vmem:[%s4747_s25 + $0x380] sm:$0xff] }
 0x82d   : > { %3284 = vmatpush.bf16.msrb.mxu0 %v4457_v55  ;;  %v1982_v18 = vadd.f32 %v1981_v13, %v1632_v56  ;;  %3264 = vmatmul.bf16.vlgmr.msrb.gmra.mxu1 %v2082_v7  ;;  %v1993_v29 = vpop.f32.mrf.mxu0  ;;  %v4476_v55 = vld [vmem:[%s4747_s25 + $0x3d0] sm:$0xff] }
 0x82e   : > { %3312 = vmatpush.bf16.msra.mxu1 %v4473_v58  ;;  %v2065_v21 = vmax.f32 %v1954_v12, 0.0  ;;  %v2021_v30 = vpop.f32.mrf.mxu1  ;;  %v1994_v54 = vadd.f32 %v1993_v29, %v1633_v46  ;;  %v4450_v58 = vld [vmem:[%s4747_s25 + $0x300] sm:$0xff] }
 0x82f   : > { %v2067_v22 = vmax.f32 %v1982_v18, 0.0  ;;  %3249 = vmatpush.bf16.msrb.mxu2 %v4426_v11  ;;  %v2022_v56 = vadd.f32 %v2021_v30, %v1635_v49 }
 0x830   : > { %v2081_v26 = vpack.c.bf16 %v2065_v21, %v2049_v9  ;;  %3277 = vmatpush.bf16.msra.mxu3 %v4442_v16  ;;  %v2052_v2 = vmax.f32 %v1994_v54, 0.0  ;;  %v4458_v16 = vld [vmem:[%s4747_s25 + $0x340] sm:$0xff] }
 0x831   : > { %3285 = vmatpush.bf16.msrb.mxu0 %v4456_v4  ;;  %v2083_v27 = vpack.c.bf16 %v2067_v22, %v2051_v3  ;;  %v2054_v7 = vmax.f32 %v2022_v56, 0.0 }
 0x832   : > { %3313 = vmatpush.bf16.msra.mxu1 %v4472_v10  ;;  %3250 = vmatmul.bf16.vlgmr.msrb.gmra.mxu2 %v2081_v26 }
 0x833   : > { %3298 = vmatpush.bf16.msra.mxu2 %v4465_v17  ;;  %3278 = vmatmul.bf16.vlgmr.msra.gmra.mxu3 %v2083_v27  ;;  %v2007_v35 = vpop.f32.mrf.mxu2  ;;  %v4474_v17 = vld [vmem:[%s4747_s25 + $0x3c0] sm:$0xff] }
 0x834   : > { %3326 = vmatpush.bf16.msrb.mxu3 %v4481_v20  ;;  %v2035_v40 = vpop.f32.mrf.mxu3  ;;  %v2008_v10 = vadd.f32 %v2007_v35, %v1634_v60 }
 0x835   : > { %3286 = vmatpush.bf16.msrb.mxu0 %v4455_v15  ;;  %v1995_v44 = vpop.f32.mrf.mxu0  ;;  %v2036_v12 = vadd.f32 %v2035_v40, %v1636_v19 }
 0x836   : > { %3314 = vmatpush.bf16.msra.mxu1 %v4471_v23  ;;  %v2023_v47 = vpop.f32.mrf.mxu1  ;;  %v1996_v50 = vadd.f32 %v1995_v44, %v1633_v46  ;;  %v2053_v20 = vmax.f32 %v2008_v10, 0.0 }
 0x837   : > { %3299 = vmatpush.bf16.msra.mxu2 %v4464_v8  ;;  %v2024_v52 = vadd.f32 %v2023_v47, %v1635_v49  ;;  %v2055_v9 = vmax.f32 %v2036_v12, 0.0 }
 0x838   : > { %3327 = vmatpush.bf16.msrb.mxu3 %v4480_v28  ;;  %v2068_v59 = vmax.f32 %v1996_v50, 0.0 }
 0x839   : > { %3287 = vmatpush.bf16.msrb.mxu0 %v4454_v37  ;;  %v2070_v63 = vmax.f32 %v2024_v52, 0.0  ;;  %v4527_v37 = vld [vmem:[%s723_s23] ss:$0 sm:$0xff] }
 0x83a   : > { %3315 = vmatpush.bf16.msra.mxu1 %v4470_v32  ;;  %v2084_v11 = vpack.c.bf16 %v2068_v59, %v2052_v2 }
 0x83b   : > { %3300 = vmatpush.bf16.msra.mxu2 %v4463_v31  ;;  %v2009_v57 = vpop.f32.mrf.mxu2  ;;  %v2086_v13 = vpack.c.bf16 %v2070_v63, %v2054_v7 }
 0x83c   : > { %3328 = vmatpush.bf16.msrb.mxu3 %v4479_v33  ;;  %v2037_v61 = vpop.f32.mrf.mxu3  ;;  %v2010_v4 = vadd.f32 %v2009_v57, %v1634_v60 }
 0x83d   : > { %3288 = vmatpush.bf16.msrb.mxu0 %v4453_v38  ;;  %v2038_v5 = vadd.f32 %v2037_v61, %v1636_v19 }
 0x83e   : > { %3316 = vmatpush.bf16.msra.mxu1 %v4469_v34  ;;  %v2069_v0 = vmax.f32 %v2010_v4, 0.0 }
 0x83f   : > { %3301 = vmatpush.bf16.msra.mxu2 %v4462_v39  ;;  %v2071_v18 = vmax.f32 %v2038_v5, 0.0 }
 0x840   : > { %3329 = vmatpush.bf16.msrb.mxu3 %v4478_v41  ;;  %v2085_v21 = vpack.c.bf16 %v2069_v0, %v2053_v20 }
 0x841   : > { %3289 = vmatpush.bf16.msrb.mxu0 %v4452_v42  ;;  %v2087_v15 = vpack.c.bf16 %v2071_v18, %v2055_v9 }
 0x842   : > { %3317 = vmatpush.bf16.msra.mxu1 %v4468_v43 }
 0x843   : > { %3302 = vmatpush.bf16.msra.mxu2 %v4461_v45 }
 0x844   : > { %3330 = vmatpush.bf16.msrb.mxu3 %v4477_v48 }
 0x845   : > { %3290 = vmatpush.bf16.msrb.mxu0 %v4451_v36 }
 0x846   : > { %3318 = vmatpush.bf16.msra.mxu1 %v4467_v51 }
 0x847   : > { %3303 = vmatpush.bf16.msra.mxu2 %v4460_v53 }
 0x848   : > { %3331 = vmatpush.bf16.msrb.mxu3 %v4476_v55 }
 0x849   : > { %3291 = vmatpush.bf16.msrb.mxu0 %v4450_v58 }
 0x84a   : > { %3319 = vmatpush.bf16.msra.mxu1 %v4466_v62 }
 0x84b   : > { %3304 = vmatpush.bf16.msra.mxu2 %v4459_v1 }
 0x84c   : > { %3332 = vmatpush.bf16.msrb.mxu3 %v4475_v6  ;;  %3292 = vmatmul.bf16.vlgmr.msrb.gmra.mxu0 %v2084_v11 }
 0x84d   : > { %3320 = vmatmul.bf16.vlgmr.msra.gmra.mxu1 %v2086_v13 }
 0x84f   : > { %3305 = vmatpush.bf16.msra.mxu2 %v4458_v16 }
 0x850   : > { %3333 = vmatpush.bf16.msrb.mxu3 %v4474_v17 }
 0x852   : > { %3306 = vmatmul.bf16.vlgmr.msra.gmra.mxu2 %v2085_v21 }
 0x853   : > { %3334 = vmatmul.bf16.vlgmr.msrb.gmra.mxu3 %v2087_v15 }
 0x889   : > { %v3125_v3 = vpop.f32.mrf.mxu0 }
 0x88a   : > { %v3153_v22 = vpop.f32.mrf.mxu1  ;;  %v3126_v32 = vadd.f32 %v4527_v37, %v3125_v3 }
 0x891   : > { %v3127_v8 = vpop.f32.mrf.mxu0 }
 0x892   : > { %v3155_v27 = vpop.f32.mrf.mxu1  ;;  %v3128_v40 = vadd.f32 %v4527_v37, %v3127_v8 }
 0x895   : > { %v3139_v23 = vpop.f32.mrf.mxu2 }
 0x896   : > { %v3167_v26 = vpop.f32.mrf.mxu3  ;;  %v3140_v31 = vadd.f32 %v3139_v23, %v3126_v32 }
 0x898   : > { %v3154_v35 = vadd.f32 %v3153_v22, %v3140_v31 }
 0x899   : > { %v3181_v30 = vpop.f32.mrf.mxu0 }
 0x89a   : > { %v3209_v33 = vpop.f32.mrf.mxu1  ;;  %v3168_v41 = vadd.f32 %v3167_v26, %v3154_v35 }
 0x89c   : > { %v3182_v45 = vadd.f32 %v3181_v30, %v3168_v41 }
 0x89d   : > { %v3141_v28 = vpop.f32.mrf.mxu2 }
 0x89e   : > { %v3169_v29 = vpop.f32.mrf.mxu3  ;;  %v3142_v42 = vadd.f32 %v3141_v28, %v3128_v40 }
 0x8a0   : > { %v3156_v46 = vadd.f32 %v3155_v27, %v3142_v42 }
 0x8a1   : > { %v3183_v39 = vpop.f32.mrf.mxu0 }
 0x8a2   : > { %v3211_v43 = vpop.f32.mrf.mxu1  ;;  %v3170_v36 = vadd.f32 %v3169_v29, %v3156_v46 }
 0x8a4   : > { %v3184_v51 = vadd.f32 %v3183_v39, %v3170_v36 }
 0x8a5   : > { %v3195_v38 = vpop.f32.mrf.mxu2 }
 0x8a6   : > { %v3223_v34 = vpop.f32.mrf.mxu3  ;;  %v3196_v48 = vadd.f32 %v3195_v38, %v3182_v45 }
 0x8a8   : > { %v3210_v50 = vadd.f32 %v3209_v33, %v3196_v48 }
 0x8a9   : > { %v3237_v49 = vpop.f32.mrf.mxu0 }
 0x8aa   : > { %v3265_v52 = vpop.f32.mrf.mxu1  ;;  %v3224_v54 = vadd.f32 %v3223_v34, %v3210_v50 }
 0x8ac   : > { %v3238_v58 = vadd.f32 %v3237_v49, %v3224_v54  ;;  %v4529_v54 = vld [vmem:[%s735_s2] ss:$0 sm:$0xff]  ;;  %s5333_s2 = sld [smem:[#allocation8_spill]] (!%p4309_p5) }
 0x8ad   : > { %v3197_v44 = vpop.f32.mrf.mxu2 }
 0x8ae   : > { %v3225_v47 = vpop.f32.mrf.mxu3  ;;  %v3198_v55 = vadd.f32 %v3197_v44, %v3184_v51 }
 0x8b0   : > { %v3212_v60 = vadd.f32 %v3211_v43, %v3198_v55 }
 0x8b1   : > { %v3239_v57 = vpop.f32.mrf.mxu0 }
 0x8b2   : > { %v3226_v61 = vadd.f32 %v3225_v47, %v3212_v60  ;;  %v3267_v62 = vpop.f32.mrf.mxu1 }
 0x8b4   : > { %v3240_v4 = vadd.f32 %v3239_v57, %v3226_v61 }
 0x8b5   : > { %v3251_v53 = vpop.f32.mrf.mxu2 }
 0x8b6   : > { %v3279_v56 = vpop.f32.mrf.mxu3  ;;  %v3252_v59 = vadd.f32 %v3251_v53, %v3238_v58 }
 0x8b8   : > { %v3266_v63 = vadd.f32 %v3265_v52, %v3252_v59  ;;  %v4528_v52 = vld [vmem:[%s732_s10] ss:$0 sm:$0xff] }
 0x8ba   : > { %v3280_v6 = vadd.f32 %v3279_v56, %v3266_v63 }
 0x8bd   : > { %v3253_v19 = vpop.f32.mrf.mxu2 }
 0x8be   : > { %v3281_v1 = vpop.f32.mrf.mxu3  ;;  %v3254_v7 = vadd.f32 %v3253_v19, %v3240_v4 }
 0x8c0   : > { %v3268_v12 = vadd.f32 %v3267_v62, %v3254_v7 }
 0x8c2   : > { %v3282_v18 = vadd.f32 %v3281_v1, %v3268_v12 }
 0x8c9   : > { %v3293_v2 = vpop.f32.mrf.mxu0 }
 0x8ca   : > { %v3294_v5 = vadd.f32 %v3293_v2, %v3280_v6  ;;  %v3321_v10 = vpop.f32.mrf.mxu1 }
 0x8d1   : > { %v3295_v17 = vpop.f32.mrf.mxu0 }
 0x8d2   : > { %v3296_v9 = vadd.f32 %v3295_v17, %v3282_v18  ;;  %v3323_v23 = vpop.f32.mrf.mxu1 }
 0x8d5   : > { %v3307_v11 = vpop.f32.mrf.mxu2 }
 0x8d6   : > { %v3308_v13 = vadd.f32 %v3307_v11, %v3294_v5  ;;  %v3335_v16 = vpop.f32.mrf.mxu3 }
 0x8d8   : > { %v3322_v0 = vadd.f32 %v3321_v10, %v3308_v13 }
 0x8da   : > { %v3336_v20 = vadd.f32 %v3335_v16, %v3322_v0 }
 0x8dc   : > { %v3340_v21 = vadd.f32 %v3336_v20, %v5020_v24 }
 0x8dd   : > { %v3309_v15 = vpop.f32.mrf.mxu2 }
 0x8de   : > { %v3310_v3 = vadd.f32 %v3309_v15, %v3296_v9  ;;  %v3344_v22 = vsel %vm808_vm2, %v3340_v21, 0.0  ;;  %v3337_v8 = vpop.f32.mrf.mxu3 }
 0x8df   : > { %3345 = vadd.xlane.f32.xlu1 %v3344_v22 }
 0x8e0   : > { %v3324_v26 = vadd.f32 %v3323_v23, %v3310_v3 }
 0x8e2   : > { %v3338_v27 = vadd.f32 %v3337_v8, %v3324_v26 }
 0x8e4   : > { %v3341_v28 = vadd.f32 %v3338_v27, %v5022_v25 }
 0x8e6   : > { %v3347_v29 = vsel %vm808_vm2, %v3341_v28, 0.0 }
 0x8e7   : > { %3348 = vadd.xlane.f32.xlu2 %v3347_v29 }
 0x952   : > { %v3346_v37 = vpop.xlane.xlu1 %3345 }
 0x953   : > { %v3350_v30 = vmul.f32 %v3346_v37, %v4950_v14 }
 0x955   : > { %v3352_v32 = vsub.f32 %v3340_v21, %v3350_v30 }
 0x957   : > { %v3354_v31 = vmul.f32 %v3352_v32, %v3352_v32 }
 0x959   : > { %v3356_v24 = vsel %vm808_vm2, %v3354_v31, 0.0 }
 0x95a   : > { %v3349_v33 = vpop.xlane.xlu2 %3348  ;;  %3357 = vadd.xlane.f32.xlu0 %v3356_v24 }
 0x95b   : > { %v3351_v38 = vmul.f32 %v3349_v33, %v4950_v14 }
 0x95d   : > { %v3353_v34 = vsub.f32 %v3341_v28, %v3351_v38 }
 0x95f   : > { %v3355_v35 = vmul.f32 %v3353_v34, %v3353_v34 }
 0x961   : > { %v3359_v39 = vsel %vm808_vm2, %v3355_v35, 0.0 }
 0x962   : > { %3360 = vadd.xlane.f32.xlu1 %v3359_v39 }
 0x9cd   : > { %v3358_v25 = vpop.xlane.xlu0 %3357 }
 0x9ce   : > { %v3362_v40 = vmul.f32 %v3358_v25, %v4950_v14 }
 0x9d0   : > { %v3364_v41 = vadd.f32 1e-05, %v3362_v40 }
 0x9d2   : > { %4568 = vrsqrt.f32 %v3364_v41  ;;  %vm3372_vm1 = vweird.f32 %v3364_v41 }
 0x9d5   : > { %v3361_v42 = vpop.xlane.xlu1 %3360 }
 0x9d6   : > { %v3363_v43 = vmul.f32 %v3361_v42, %v4950_v14 }
 0x9d8   : > { %v4569_v44 = vpop.eup %4568  ;;  %v3365_v45 = vadd.f32 1e-05, %v3363_v43 }
 0x9d9   : > { %v3367_v46 = vmul.f32 %v4569_v44, %v3364_v41  ;;  %vm3373_vm0 = vweird.f32 %v4569_v44 }
 0x9da   : > { %4570 = vrsqrt.f32 %v3365_v45  ;;  %vm3374_vm4 = vmor %vm3372_vm1, %vm3373_vm0  ;;  %vm3382_vm6 = vweird.f32 %v3365_v45 }
 0x9db   : > { %v3368_v47 = vmul.f32 %v4569_v44, %v3367_v46 }
 0x9dd   : > { %v3369_v48 = vmul.f32 0.5, %v3368_v47 }
 0x9df   : > { %v3370_v49 = vsub.f32 1.5, %v3369_v48 }
 0x9e0   : > { %v4571_v36 = vpop.eup %4570 }
 0x9e1   : > { %v3371_v50 = vmul.f32 %v4569_v44, %v3370_v49  ;;  %v3377_v51 = vmul.f32 %v4571_v36, %v3365_v45  ;;  %vm3383_vm5 = vweird.f32 %v4571_v36 }
 0x9e2   : > { %vm3384_vm7 = vmor %vm3382_vm6, %vm3383_vm5 }
 0x9e3   : > { %v3375_v14 = vsel %vm3374_vm4, %v4569_v44, %v3371_v50  ;;  %v3378_v53 = vmul.f32 %v4571_v36, %v3377_v51 }
 0x9e4   : > { %v3386_v55 = vmul.f32 %v3375_v14, %v3352_v32 }
 0x9e5   : > { %v3379_v56 = vmul.f32 0.5, %v3378_v53 }
 0x9e6   : > { %v3391_v57 = vmul.f32 %v4528_v52, %v3386_v55 }
 0x9e7   : > { %v3380_v58 = vsub.f32 1.5, %v3379_v56 }
 0x9e8   : > { %v3396_v60 = vadd.f32 %v4529_v54, %v3391_v57 }
 0x9e9   : > { %v3381_v59 = vmul.f32 %v4571_v36, %v3380_v58 }
 0x9ea   : > { %3398 = vst.msk [vmem:[#allocation2] sm:$0xff] %vm808_vm2, %v3396_v60 }
 0x9eb   : > { %v3385_v61 = vsel %vm3384_vm7, %v4571_v36, %v3381_v59 }
 0x9ec   : > { %v3387_v62 = vmul.f32 %v3385_v61, %v3353_v34 }
 0x9ee   : > { %v3392_v19 = vmul.f32 %v4528_v52, %v3387_v62  ;;  %3403 = sbr.rel (%p4309_p5) target bundleno = 2712 (0xa98), region = 100 }
 0x9f0   : > { %v3397_v63 = vadd.f32 %v4529_v54, %v3392_v19 }
 0x9f2   : > { %3399 = vst.msk [vmem:[#allocation2 + $0x8] sm:$0xff] %vm808_vm2, %v3397_v63 }
 0x9f3   : > { %v3407_v1 = vld [vmem:[%s5333_s2 + $0x18] sm:$0xff]  ;;  %v3406_v2 = vld [vmem:[%s5333_s2 + $0x10] sm:$0xff]  ;;  %v3405_v4 = vld [vmem:[%s5333_s2 + $0x8] sm:$0xff]  ;;  %vm3454_vm3 = vcmask 31744  }
 0x9f4   : > { %3427 = vmatpush.msra.mxu0 %v3407_v1  ;;  %v3404_v6 = vld [vmem:[%s5333_s2] sm:$0xff] }
 0x9f5   : > { %v4572_v7 = vld [vmem:[%s5334_s11] ss:$0 sm:$0xff] }
 0x9f6   : > { %3428 = vmatpush.msra.mxu0 %v3406_v2 }
 0x9f8   : > { %3429 = vmatpush.msra.mxu0 %v3405_v4 }
 0x9fa   : > { %3430 = vmatpush.msra.mxu0 %v3404_v6 }
 0x9fb   : > { %4310 = vmatmul.msk.f32.vlgmr.msra.gmra.mxu0 %vm808_vm2, %v3396_v60 }
 0xa78   : > { %v3432_v5 = vpop.f32.mrf.mxu0 }
 0xa79   : > { %v3433_v10 = vadd.f32 %v4572_v7, %v3432_v5 }
 0xa7b   : > { %v4311_v11 = vmul.f32 -1.442695, %v3433_v10 }
 0xa7d   : > { %4573 = vpow2.f32 %v4311_v11 }
 0xa83   : > { %v4574_v12 = vpop.eup %4573 }
 0xa84   : > { %v3438_v13 = vadd.f32 1.0, %v4574_v12 }
 0xa86   : > { %4575 = vrcp.f32 %v3438_v13  ;;  %v3450_v18 = vand.u32 2147483648, %v3438_v13  ;;  %v3448_v9 = vand.u32 2147483647, %v3438_v13  ;;  %vm3444_vm2 = vweird.f32 %v3438_v13 }
 0xa88   : > { %v3451_v15 = vor.u32 1.1754944e-38, %v3450_v18  ;;  %vm3449_vm10 = vcmp.eq.f32.partialorder %v3448_v9, 8.507059e+37 }
 0xa8c   : > { %v4576_v16 = vpop.eup %4575 }
 0xa8d   : > { %v3440_v0 = vmul.f32 %v4576_v16, %v3438_v13  ;;  %vm3445_vm8 = vweird.f32 %v4576_v16 }
 0xa8e   : > { %vm3446_vm9 = vmor %vm3444_vm2, %vm3445_vm8 }
 0xa8f   : > { %v3441_v17 = vsub.f32 1.0, %v3440_v0 }
 0xa91   : > { %v3442_v20 = vmul.f32 %v4576_v16, %v3441_v17 }
 0xa93   : > { %v3443_v21 = vadd.f32 %v4576_v16, %v3442_v20 }
 0xa95   : > { %v3447_v3 = vsel %vm3446_vm9, %v4576_v16, %v3443_v21 }
 0xa96   : > { %v3452_v22 = vsel %vm3449_vm10, %v3451_v15, %v3447_v3 }
 0xa97   : > { %3455 = vst.msk [vmem:[%s5335_s0] sm:$0xff] %vm3454_vm3, %v3452_v22 }
 0xa98 PF: > { %s5336_s20 = sld [smem:[#allocation3_spill]] }
 0xa9e   : > { %s28_s27 = sadd.s32 1, %s5336_s20  }
 0xa9f   : > { %p25_p6 = scmp.ge.s32.totalorder %s28_s27, 4  }
 0xaa1   :  { %27 = sbr.rel (!%p25_p6) target bundleno = 11 (0xb), region = 159 }

</bundles_post_ra>
